<compile_context>
chip_gen: v7x
topology: tpu7x:2x2x1
jax: 0.10.0
libtpu: 0.0.40
codegen_flags: <defaults>
</compile_context>

<pallas_src>
import jax
import jax.numpy as jnp
from jax.experimental import pallas as pl
from jax.experimental.pallas import tpu as pltpu
import numpy as np


def rnnnet_kernel(inputs_ref,                  # (T, 1)  f32
                  a1_ref, c1b_ref,             # (1, 4H) f32  folded layer-1 input path (g cols pre-scaled x2)
                  w_f_ref,                     # (2H, 8H) bf16 fused recurrent + layer-2-input weight
                  b2_ref,                      # (1, 4H) f32  layer-2 bias (g cols pre-scaled x2)
                  w_out_ref, b_out_ref,        # (1, H) f32, (1, 1) f32
                  out_ref, h_out_ref, c_out_ref,   # (T, 1), (2, H), (2, H)
                  ih1_ref, h2_hist_ref):       # scratch: (T, 4H) f32, (T, H) f32
    T = inputs_ref.shape[0]
    H = h_out_ref.shape[1]
    G = 4 * H

    # Hoisted layer-1 input projection for all timesteps (rank-1 in the scalar
    # input -> one broadcast multiply-add; layer-1 bias already folded in; f32).
    ih1_ref[...] = inputs_ref[...] * a1_ref[...] + c1b_ref[...]

    def lstm_elementwise(gates, c_prev):
        # Single sigmoid over the full (1,4H) gate vreg.  The g-gate
        # pre-activation was pre-scaled by 2 in the wrapper, so
        # tanh(x) = 2*sigmoid(2x) - 1 is recovered with one VPU fma.
        sg = jax.nn.sigmoid(gates)
        i = sg[:, 0:H]
        f = sg[:, H:2 * H]
        g = 2.0 * sg[:, 2 * H:3 * H] - 1.0
        o = sg[:, 3 * H:4 * H]
        c_new = f * c_prev + i * g
        h_new = o * jnp.tanh(c_new)
        return h_new, c_new

    zeros = jnp.zeros((1, H), jnp.float32)

    # Pipeline prologue (t = 0): layer-1 only; h1_{-1} = c1_{-1} = 0, so the
    # recurrent MXU contribution is exactly zero and is skipped statically.
    h1, c1 = lstm_elementwise(ih1_ref[pl.ds(0, 1), :], zeros)
    h2, c2 = zeros, zeros

    # Pipelined steps: iteration t computes layer-2(t-1) and layer-1(t) from
    # ONE fused MXU push.  Static Python loop (T is static) -> fully unrolled;
    # boundary iterations specialize away dead work at trace time.
    for t in range(1, T + 1):
        w_f = w_f_ref[...]             # re-read per step: don't pin ~8 vregs of
        b2 = b2_ref[...]               # weights live across the unrolled loop
        hh = jnp.concatenate([h1, h2], axis=1).astype(jnp.bfloat16)    # (1, 2H)
        rec = jnp.dot(hh, w_f, preferred_element_type=jnp.float32)     # (1, 8H)

        # Layer-2 step (t-1): pre-activation =
        #   h1_{t-1} @ W_ih2^T + h2_{t-2} @ W_hh2^T + b2  (all inside rec + b2).
        h2, c2 = lstm_elementwise(rec[:, G:2 * G] + b2, c2)
        h2_hist_ref[pl.ds(t - 1, 1), :] = h2

        # Layer-1 step (t): skipped on the pipeline drain iteration (t == T).
        if t < T:
            h1, c1 = lstm_elementwise(ih1_ref[pl.ds(t, 1), :] + rec[:, 0:G], c1)

    # Hoisted output Linear(H,1): VPU broadcast-multiply + lane reduce
    # (exact f32; avoids a degenerate N=1 f32 MXU push).
    out_ref[...] = (jnp.sum(h2_hist_ref[...] * w_out_ref[...],
                            axis=1, keepdims=True)
                    + b_out_ref[...])

    h_out_ref[0:1, :] = h1
    h_out_ref[1:2, :] = h2
    c_out_ref[0:1, :] = c1
    c_out_ref[1:2, :] = c2


def rnnnet_forward(inputs, params):
    """inputs: (T,) f32 sequence of scalars.

    Returns (outputs(T,1,1), (h(2,1,H), c(2,1,H))) matching PyTorch
    RNNNet.forward with force=True, eval mode.
    """
    T = inputs.shape[0]
    H = params["w_inp"].shape[0]
    f32 = jnp.float32

    # Rearrange PyTorch-layout params into kernel layout (gate order i,f,g,o).
    w_inp_row = params["w_inp"].reshape(H, 1).T.astype(f32)        # (1, H)
    b_inp = params["b_inp"].reshape(1, H).astype(f32)
    w_ih1 = params["w_ih_l0"].T.astype(f32)                        # (H, 4H)
    w_hh1 = params["w_hh_l0"].T.astype(f32)                        # (H, 4H)
    b1 = (params["b_ih_l0"] + params["b_hh_l0"]).reshape(1, 4 * H).astype(f32)
    w_ih2 = params["w_ih_l1"].T.astype(f32)                        # (H, 4H)
    w_hh2 = params["w_hh_l1"].T.astype(f32)                        # (H, 4H)
    b2 = (params["b_ih_l1"] + params["b_hh_l1"]).reshape(1, 4 * H).astype(f32)
    w_out_row = params["w_out"].reshape(1, H).astype(f32)          # (1, H)
    b_out = params["b_out"].reshape(1, 1).astype(f32)

    # Rank-1 hoist: fold Linear(1,H) through layer-1's input weights (exact, f32).
    a1 = w_inp_row @ w_ih1                                         # (1, 4H)
    c1b = b_inp @ w_ih1 + b1                                       # (1, 4H)

    # Sigmoid-only gate trick: pre-scale every g-gate pre-activation column by
    # 2 so the kernel can use g = 2*sigmoid(2x) - 1 = tanh(x).  The power-of-2
    # scale is exact, including after the bf16 cast of the weights.
    gate_scale = jnp.concatenate(
        [jnp.ones((1, 2 * H), f32),
         jnp.full((1, H), 2.0, f32),
         jnp.ones((1, H), f32)], axis=1)                           # (1, 4H)
    a1 = a1 * gate_scale
    c1b = c1b * gate_scale
    b2 = b2 * gate_scale

    # Fused per-step weight: [h1 | h2] (1,2H) @ W_f (2H,8H) produces BOTH
    # layers' MXU contributions in one push:
    #   cols 0:4H  = h1 @ W_hh1^T                  (layer-1 recurrence, step t)
    #   cols 4H:8H = h1 @ W_ih2^T + h2 @ W_hh2^T   (layer-2 pre-activation, step t-1)
    z = jnp.zeros((H, 4 * H), f32)
    w_f = jnp.concatenate([
        jnp.concatenate([w_hh1 * gate_scale, w_ih2 * gate_scale], axis=1),
        jnp.concatenate([z, w_hh2 * gate_scale], axis=1),
    ], axis=0).astype(jnp.bfloat16)                                # (2H, 8H)

    x = inputs.astype(f32).reshape(T, 1)

    vmem = pl.BlockSpec(memory_space=pltpu.MemorySpace.VMEM)
    outputs, h, c = pl.pallas_call(
        rnnnet_kernel,
        out_shape=(
            jax.ShapeDtypeStruct((T, 1), f32),
            jax.ShapeDtypeStruct((2, H), f32),
            jax.ShapeDtypeStruct((2, H), f32),
        ),
        in_specs=[vmem] * 7,
        out_specs=(vmem, vmem, vmem),
        scratch_shapes=[
            pltpu.VMEM((T, 4 * H), f32),   # ih1_all
            pltpu.VMEM((T, H), f32),       # h2 history
        ],
    )(x, a1, c1b, w_f, b2, w_out_row, b_out)

    return outputs.reshape(T, 1, 1), (h.reshape(2, 1, H), c.reshape(2, 1, H))


def rnnnet_reference(inputs, params):
    """Pure-JAX f32 reference matching PyTorch RNNNet.forward (force=True, eval)."""
    T = inputs.shape[0]
    H = params["w_inp"].shape[0]

    def cell(x, h, c, w_ih, w_hh, b_ih, b_hh):
        gates = x @ w_ih.T + b_ih + h @ w_hh.T + b_hh
        i, f, g, o = jnp.split(gates, 4, axis=-1)
        i, f, o = jax.nn.sigmoid(i), jax.nn.sigmoid(f), jax.nn.sigmoid(o)
        g = jnp.tanh(g)
        c_new = f * c + i * g
        return o * jnp.tanh(c_new), c_new

    h1 = c1 = h2 = c2 = jnp.zeros((1, H), jnp.float32)
    ys = []
    for t in range(T):
        x = inputs[t].reshape(1, 1) @ params["w_inp"].reshape(H, 1).T + params["b_inp"]
        h1, c1 = cell(x, h1, c1, params["w_ih_l0"], params["w_hh_l0"],
                      params["b_ih_l0"], params["b_hh_l0"])
        h2, c2 = cell(h1, h2, c2, params["w_ih_l1"], params["w_hh_l1"],
                      params["b_ih_l1"], params["b_hh_l1"])
        ys.append(h2 @ params["w_out"].reshape(1, H).T + params["b_out"])
    outputs = jnp.stack(ys).reshape(T, 1, 1)
    return outputs, (jnp.stack([h1, h2]), jnp.stack([c1, c2]))


def init_params(key, H):
    """Deterministic init with PyTorch-style uniform bounds."""
    ks = jax.random.split(key, 14)
    u = lambda k, shape, bound: jax.random.uniform(
        k, shape, jnp.float32, -bound, bound)
    s = 1.0 / np.sqrt(H)
    return {
        "w_inp":  u(ks[0], (H, 1), 1.0),          # Linear(1, H).weight
        "b_inp":  u(ks[1], (H,), 1.0),
        "w_ih_l0": u(ks[2], (4 * H, H), s),        # LSTM layer 0
        "w_hh_l0": u(ks[3], (4 * H, H), s),
        "b_ih_l0": u(ks[4], (4 * H,), s),
        "b_hh_l0": u(ks[5], (4 * H,), s),
        "w_ih_l1": u(ks[6], (4 * H, H), s),        # LSTM layer 1
        "w_hh_l1": u(ks[7], (4 * H, H), s),
        "b_ih_l1": u(ks[8], (4 * H,), s),
        "b_hh_l1": u(ks[9], (4 * H,), s),
        "w_out":  u(ks[10], (1, H), s),            # Linear(H, 1).weight
        "b_out":  u(ks[11], (1,), s),
    }


if __name__ == "__main__":
    H = 32       # hidden_size
    T = 8        # sequence length (steps)

    key = jax.random.PRNGKey(0)
    pkey, xkey = jax.random.split(key)
    params = init_params(pkey, H)
    inputs = jax.random.normal(xkey, (T,), jnp.float32)   # sequence of scalars

    outputs, (h, c) = rnnnet_forward(inputs, params)
    jax.block_until_ready((outputs, h, c))

    ref_out, (ref_h, ref_c) = rnnnet_reference(inputs, params)
    assert outputs.shape == (T, 1, 1)
    assert h.shape == (2, 1, H) and c.shape == (2, 1, H)
    # Tolerances account for bf16 MXU inputs (f32 accumulation, f32 state/gates).
    np.testing.assert_allclose(np.asarray(outputs), np.asarray(ref_out),
                               rtol=2e-2, atol=2e-2)
    np.testing.assert_allclose(np.asarray(h), np.asarray(ref_h),
                               rtol=2e-2, atol=2e-2)
    np.testing.assert_allclose(np.asarray(c), np.asarray(ref_c),
                               rtol=2e-2, atol=2e-2)

    print("KERNEL_OK")
</pallas_src>

<mosaic_0001>
module attributes {stable_mosaic.version = 11 : i64} {
  func.func @rnnnet_kernel(%arg0: memref<8x1xf32, #tpu.memory_space<vmem>>, %arg1: memref<1x128xf32, #tpu.memory_space<vmem>>, %arg2: memref<1x128xf32, #tpu.memory_space<vmem>>, %arg3: memref<64x256xbf16, #tpu.memory_space<vmem>>, %arg4: memref<1x128xf32, #tpu.memory_space<vmem>>, %arg5: memref<1x32xf32, #tpu.memory_space<vmem>>, %arg6: memref<1x1xf32, #tpu.memory_space<vmem>>, %arg7: memref<8x1xf32, #tpu.memory_space<vmem>>, %arg8: memref<2x32xf32, #tpu.memory_space<vmem>>, %arg9: memref<2x32xf32, #tpu.memory_space<vmem>>, %arg10: memref<8x128xf32, #tpu.memory_space<vmem>>, %arg11: memref<8x32xf32, #tpu.memory_space<vmem>>) attributes {dimension_semantics = [], scalar_prefetch = 0 : i64, scratch_operands = 2 : i64, tpu.core_type = #tpu.core_type<tc>} {
    %c0 = arith.constant 0 : index
    %c0_0 = arith.constant 0 : index
    %0 = vector.load %arg0[%c0, %c0_0] : memref<8x1xf32, #tpu.memory_space<vmem>>, vector<8x1xf32>
    %c0_1 = arith.constant 0 : index
    %c0_2 = arith.constant 0 : index
    %1 = vector.load %arg1[%c0_1, %c0_2] : memref<1x128xf32, #tpu.memory_space<vmem>>, vector<1x128xf32>
    %2 = vector.broadcast %0 : vector<8x1xf32> to vector<8x128xf32>
    %3 = vector.broadcast %1 : vector<1x128xf32> to vector<8x128xf32>
    %4 = arith.mulf %2, %3 : vector<8x128xf32>
    %c0_3 = arith.constant 0 : index
    %c0_4 = arith.constant 0 : index
    %5 = vector.load %arg2[%c0_3, %c0_4] : memref<1x128xf32, #tpu.memory_space<vmem>>, vector<1x128xf32>
    %6 = vector.broadcast %5 : vector<1x128xf32> to vector<8x128xf32>
    %7 = arith.addf %4, %6 : vector<8x128xf32>
    %c0_5 = arith.constant 0 : index
    %c0_6 = arith.constant 0 : index
    %8 = vector.load %arg10[%c0_5, %c0_6] : memref<8x128xf32, #tpu.memory_space<vmem>>, vector<8x128xf32>
    tpu.vector_store %arg10[%c0_5, %c0_6], %7 {strides = array<i32>} : memref<8x128xf32, #tpu.memory_space<vmem>>, vector<8x128xf32>,
    %cst = arith.constant 0.000000e+00 : f32
    %9 = vector.broadcast %cst : f32 to vector<1x32xf32>
    %c0_7 = arith.constant 0 : index
    %c0_8 = arith.constant 0 : index
    %10 = vector.load %arg10[%c0_7, %c0_8] : memref<8x128xf32, #tpu.memory_space<vmem>>, vector<1x128xf32>
    %11 = arith.negf %10 : vector<1x128xf32>
    %12 = math.exp %11 : vector<1x128xf32>
    %cst_9 = arith.constant 1.000000e+00 : f32
    %13 = vector.broadcast %cst_9 : f32 to vector<1x128xf32>
    %14 = arith.addf %13, %12 : vector<1x128xf32>
    %15 = arith.divf %13, %14 : vector<1x128xf32>
    %16 = vector.extract_strided_slice %15 {offsets = [0, 0], sizes = [1, 32], strides = [1, 1]} : vector<1x128xf32> to vector<1x32xf32>
    %17 = vector.extract_strided_slice %15 {offsets = [0, 32], sizes = [1, 32], strides = [1, 1]} : vector<1x128xf32> to vector<1x32xf32>
    %18 = vector.extract_strided_slice %15 {offsets = [0, 64], sizes = [1, 32], strides = [1, 1]} : vector<1x128xf32> to vector<1x32xf32>
    %cst_10 = arith.constant 2.000000e+00 : f32
    %19 = vector.broadcast %cst_10 : f32 to vector<1x32xf32>
    %20 = arith.mulf %19, %18 : vector<1x32xf32>
    %cst_11 = arith.constant 1.000000e+00 : f32
    %21 = vector.broadcast %cst_11 : f32 to vector<1x32xf32>
    %22 = arith.subf %20, %21 : vector<1x32xf32>
    %23 = vector.extract_strided_slice %15 {offsets = [0, 96], sizes = [1, 32], strides = [1, 1]} : vector<1x128xf32> to vector<1x32xf32>
    %24 = arith.mulf %17, %9 : vector<1x32xf32>
    %25 = arith.mulf %16, %22 : vector<1x32xf32>
    %26 = arith.addf %24, %25 : vector<1x32xf32>
    %27 = math.tanh %26 : vector<1x32xf32>
    %28 = arith.mulf %23, %27 : vector<1x32xf32>
    %c0_12 = arith.constant 0 : index
    %c0_13 = arith.constant 0 : index
    %29 = vector.load %arg3[%c0_12, %c0_13] : memref<64x256xbf16, #tpu.memory_space<vmem>>, vector<64x256xbf16>
    %c0_14 = arith.constant 0 : index
    %c0_15 = arith.constant 0 : index
    %30 = vector.load %arg4[%c0_14, %c0_15] : memref<1x128xf32, #tpu.memory_space<vmem>>, vector<1x128xf32>
    %31 = tpu.concatenate %28, %9 in 1 : vector<1x32xf32>, vector<1x32xf32> -> vector<1x64xf32>
    %32 = arith.truncf %31 : vector<1x64xf32> to vector<1x64xbf16>
    %cst_16 = arith.constant dense<0.000000e+00> : vector<1x256xf32>
    %33 = tpu.matmul %32, %29, %cst_16 {dimension_numbers = #tpu.dot_dimension_numbers<[1], [0], [0], [1], [0, 0, 1, 1], [], []>} : vector<1x64xbf16>, vector<64x256xbf16>, vector<1x256xf32> -> vector<1x256xf32>
    %34 = vector.extract_strided_slice %33 {offsets = [0, 128], sizes = [1, 128], strides = [1, 1]} : vector<1x256xf32> to vector<1x128xf32>
    %35 = arith.addf %34, %30 : vector<1x128xf32>
    %36 = arith.negf %35 : vector<1x128xf32>
    %37 = math.exp %36 : vector<1x128xf32>
    %cst_17 = arith.constant 1.000000e+00 : f32
    %38 = vector.broadcast %cst_17 : f32 to vector<1x128xf32>
    %39 = arith.addf %38, %37 : vector<1x128xf32>
    %40 = arith.divf %38, %39 : vector<1x128xf32>
    %41 = vector.extract_strided_slice %40 {offsets = [0, 0], sizes = [1, 32], strides = [1, 1]} : vector<1x128xf32> to vector<1x32xf32>
    %42 = vector.extract_strided_slice %40 {offsets = [0, 32], sizes = [1, 32], strides = [1, 1]} : vector<1x128xf32> to vector<1x32xf32>
    %43 = vector.extract_strided_slice %40 {offsets = [0, 64], sizes = [1, 32], strides = [1, 1]} : vector<1x128xf32> to vector<1x32xf32>
    %cst_18 = arith.constant 2.000000e+00 : f32
    %44 = vector.broadcast %cst_18 : f32 to vector<1x32xf32>
    %45 = arith.mulf %44, %43 : vector<1x32xf32>
    %cst_19 = arith.constant 1.000000e+00 : f32
    %46 = vector.broadcast %cst_19 : f32 to vector<1x32xf32>
    %47 = arith.subf %45, %46 : vector<1x32xf32>
    %48 = vector.extract_strided_slice %40 {offsets = [0, 96], sizes = [1, 32], strides = [1, 1]} : vector<1x128xf32> to vector<1x32xf32>
    %49 = arith.mulf %42, %9 : vector<1x32xf32>
    %50 = arith.mulf %41, %47 : vector<1x32xf32>
    %51 = arith.addf %49, %50 : vector<1x32xf32>
    %52 = math.tanh %51 : vector<1x32xf32>
    %53 = arith.mulf %48, %52 : vector<1x32xf32>
    %c0_20 = arith.constant 0 : index
    %c0_21 = arith.constant 0 : index
    %54 = vector.load %arg11[%c0_20, %c0_21] : memref<8x32xf32, #tpu.memory_space<vmem>>, vector<1x32xf32>
    tpu.vector_store %arg11[%c0_20, %c0_21], %53 {strides = array<i32>} : memref<8x32xf32, #tpu.memory_space<vmem>>, vector<1x32xf32>,
    %c1 = arith.constant 1 : index
    %c0_22 = arith.constant 0 : index
    %55 = vector.load %arg10[%c1, %c0_22] : memref<8x128xf32, #tpu.memory_space<vmem>>, vector<1x128xf32>
    %56 = vector.extract_strided_slice %33 {offsets = [0, 0], sizes = [1, 128], strides = [1, 1]} : vector<1x256xf32> to vector<1x128xf32>
    %57 = arith.addf %55, %56 : vector<1x128xf32>
    %58 = arith.negf %57 : vector<1x128xf32>
    %59 = math.exp %58 : vector<1x128xf32>
    %cst_23 = arith.constant 1.000000e+00 : f32
    %60 = vector.broadcast %cst_23 : f32 to vector<1x128xf32>
    %61 = arith.addf %60, %59 : vector<1x128xf32>
    %62 = arith.divf %60, %61 : vector<1x128xf32>
    %63 = vector.extract_strided_slice %62 {offsets = [0, 0], sizes = [1, 32], strides = [1, 1]} : vector<1x128xf32> to vector<1x32xf32>
    %64 = vector.extract_strided_slice %62 {offsets = [0, 32], sizes = [1, 32], strides = [1, 1]} : vector<1x128xf32> to vector<1x32xf32>
    %65 = vector.extract_strided_slice %62 {offsets = [0, 64], sizes = [1, 32], strides = [1, 1]} : vector<1x128xf32> to vector<1x32xf32>
    %cst_24 = arith.constant 2.000000e+00 : f32
    %66 = vector.broadcast %cst_24 : f32 to vector<1x32xf32>
    %67 = arith.mulf %66, %65 : vector<1x32xf32>
    %cst_25 = arith.constant 1.000000e+00 : f32
    %68 = vector.broadcast %cst_25 : f32 to vector<1x32xf32>
    %69 = arith.subf %67, %68 : vector<1x32xf32>
    %70 = vector.extract_strided_slice %62 {offsets = [0, 96], sizes = [1, 32], strides = [1, 1]} : vector<1x128xf32> to vector<1x32xf32>
    %71 = arith.mulf %64, %26 : vector<1x32xf32>
    %72 = arith.mulf %63, %69 : vector<1x32xf32>
    %73 = arith.addf %71, %72 : vector<1x32xf32>
    %74 = math.tanh %73 : vector<1x32xf32>
    %75 = arith.mulf %70, %74 : vector<1x32xf32>
    %c0_26 = arith.constant 0 : index
    %c0_27 = arith.constant 0 : index
    %76 = vector.load %arg3[%c0_26, %c0_27] : memref<64x256xbf16, #tpu.memory_space<vmem>>, vector<64x256xbf16>
    %c0_28 = arith.constant 0 : index
    %c0_29 = arith.constant 0 : index
    %77 = vector.load %arg4[%c0_28, %c0_29] : memref<1x128xf32, #tpu.memory_space<vmem>>, vector<1x128xf32>
    %78 = tpu.concatenate %75, %53 in 1 : vector<1x32xf32>, vector<1x32xf32> -> vector<1x64xf32>
    %79 = arith.truncf %78 : vector<1x64xf32> to vector<1x64xbf16>
    %cst_30 = arith.constant dense<0.000000e+00> : vector<1x256xf32>
    %80 = tpu.matmul %79, %76, %cst_30 {dimension_numbers = #tpu.dot_dimension_numbers<[1], [0], [0], [1], [0, 0, 1, 1], [], []>} : vector<1x64xbf16>, vector<64x256xbf16>, vector<1x256xf32> -> vector<1x256xf32>
    %81 = vector.extract_strided_slice %80 {offsets = [0, 128], sizes = [1, 128], strides = [1, 1]} : vector<1x256xf32> to vector<1x128xf32>
    %82 = arith.addf %81, %77 : vector<1x128xf32>
    %83 = arith.negf %82 : vector<1x128xf32>
    %84 = math.exp %83 : vector<1x128xf32>
    %cst_31 = arith.constant 1.000000e+00 : f32
    %85 = vector.broadcast %cst_31 : f32 to vector<1x128xf32>
    %86 = arith.addf %85, %84 : vector<1x128xf32>
    %87 = arith.divf %85, %86 : vector<1x128xf32>
    %88 = vector.extract_strided_slice %87 {offsets = [0, 0], sizes = [1, 32], strides = [1, 1]} : vector<1x128xf32> to vector<1x32xf32>
    %89 = vector.extract_strided_slice %87 {offsets = [0, 32], sizes = [1, 32], strides = [1, 1]} : vector<1x128xf32> to vector<1x32xf32>
    %90 = vector.extract_strided_slice %87 {offsets = [0, 64], sizes = [1, 32], strides = [1, 1]} : vector<1x128xf32> to vector<1x32xf32>
    %cst_32 = arith.constant 2.000000e+00 : f32
    %91 = vector.broadcast %cst_32 : f32 to vector<1x32xf32>
    %92 = arith.mulf %91, %90 : vector<1x32xf32>
    %cst_33 = arith.constant 1.000000e+00 : f32
    %93 = vector.broadcast %cst_33 : f32 to vector<1x32xf32>
    %94 = arith.subf %92, %93 : vector<1x32xf32>
    %95 = vector.extract_strided_slice %87 {offsets = [0, 96], sizes = [1, 32], strides = [1, 1]} : vector<1x128xf32> to vector<1x32xf32>
    %96 = arith.mulf %89, %51 : vector<1x32xf32>
    %97 = arith.mulf %88, %94 : vector<1x32xf32>
    %98 = arith.addf %96, %97 : vector<1x32xf32>
    %99 = math.tanh %98 : vector<1x32xf32>
    %100 = arith.mulf %95, %99 : vector<1x32xf32>
    %c1_34 = arith.constant 1 : index
    %c0_35 = arith.constant 0 : index
    %101 = vector.load %arg11[%c1_34, %c0_35] : memref<8x32xf32, #tpu.memory_space<vmem>>, vector<1x32xf32>
    tpu.vector_store %arg11[%c1_34, %c0_35], %100 {strides = array<i32>} : memref<8x32xf32, #tpu.memory_space<vmem>>, vector<1x32xf32>,
    %c2 = arith.constant 2 : index
    %c0_36 = arith.constant 0 : index
    %102 = vector.load %arg10[%c2, %c0_36] : memref<8x128xf32, #tpu.memory_space<vmem>>, vector<1x128xf32>
    %103 = vector.extract_strided_slice %80 {offsets = [0, 0], sizes = [1, 128], strides = [1, 1]} : vector<1x256xf32> to vector<1x128xf32>
    %104 = arith.addf %102, %103 : vector<1x128xf32>
    %105 = arith.negf %104 : vector<1x128xf32>
    %106 = math.exp %105 : vector<1x128xf32>
    %cst_37 = arith.constant 1.000000e+00 : f32
    %107 = vector.broadcast %cst_37 : f32 to vector<1x128xf32>
    %108 = arith.addf %107, %106 : vector<1x128xf32>
    %109 = arith.divf %107, %108 : vector<1x128xf32>
    %110 = vector.extract_strided_slice %109 {offsets = [0, 0], sizes = [1, 32], strides = [1, 1]} : vector<1x128xf32> to vector<1x32xf32>
    %111 = vector.extract_strided_slice %109 {offsets = [0, 32], sizes = [1, 32], strides = [1, 1]} : vector<1x128xf32> to vector<1x32xf32>
    %112 = vector.extract_strided_slice %109 {offsets = [0, 64], sizes = [1, 32], strides = [1, 1]} : vector<1x128xf32> to vector<1x32xf32>
    %cst_38 = arith.constant 2.000000e+00 : f32
    %113 = vector.broadcast %cst_38 : f32 to vector<1x32xf32>
    %114 = arith.mulf %113, %112 : vector<1x32xf32>
    %cst_39 = arith.constant 1.000000e+00 : f32
    %115 = vector.broadcast %cst_39 : f32 to vector<1x32xf32>
    %116 = arith.subf %114, %115 : vector<1x32xf32>
    %117 = vector.extract_strided_slice %109 {offsets = [0, 96], sizes = [1, 32], strides = [1, 1]} : vector<1x128xf32> to vector<1x32xf32>
    %118 = arith.mulf %111, %73 : vector<1x32xf32>
    %119 = arith.mulf %110, %116 : vector<1x32xf32>
    %120 = arith.addf %118, %119 : vector<1x32xf32>
    %121 = math.tanh %120 : vector<1x32xf32>
    %122 = arith.mulf %117, %121 : vector<1x32xf32>
    %c0_40 = arith.constant 0 : index
    %c0_41 = arith.constant 0 : index
    %123 = vector.load %arg3[%c0_40, %c0_41] : memref<64x256xbf16, #tpu.memory_space<vmem>>, vector<64x256xbf16>
    %c0_42 = arith.constant 0 : index
    %c0_43 = arith.constant 0 : index
    %124 = vector.load %arg4[%c0_42, %c0_43] : memref<1x128xf32, #tpu.memory_space<vmem>>, vector<1x128xf32>
    %125 = tpu.concatenate %122, %100 in 1 : vector<1x32xf32>, vector<1x32xf32> -> vector<1x64xf32>
    %126 = arith.truncf %125 : vector<1x64xf32> to vector<1x64xbf16>
    %cst_44 = arith.constant dense<0.000000e+00> : vector<1x256xf32>
    %127 = tpu.matmul %126, %123, %cst_44 {dimension_numbers = #tpu.dot_dimension_numbers<[1], [0], [0], [1], [0, 0, 1, 1], [], []>} : vector<1x64xbf16>, vector<64x256xbf16>, vector<1x256xf32> -> vector<1x256xf32>
    %128 = vector.extract_strided_slice %127 {offsets = [0, 128], sizes = [1, 128], strides = [1, 1]} : vector<1x256xf32> to vector<1x128xf32>
    %129 = arith.addf %128, %124 : vector<1x128xf32>
    %130 = arith.negf %129 : vector<1x128xf32>
    %131 = math.exp %130 : vector<1x128xf32>
    %cst_45 = arith.constant 1.000000e+00 : f32
    %132 = vector.broadcast %cst_45 : f32 to vector<1x128xf32>
    %133 = arith.addf %132, %131 : vector<1x128xf32>
    %134 = arith.divf %132, %133 : vector<1x128xf32>
    %135 = vector.extract_strided_slice %134 {offsets = [0, 0], sizes = [1, 32], strides = [1, 1]} : vector<1x128xf32> to vector<1x32xf32>
    %136 = vector.extract_strided_slice %134 {offsets = [0, 32], sizes = [1, 32], strides = [1, 1]} : vector<1x128xf32> to vector<1x32xf32>
    %137 = vector.extract_strided_slice %134 {offsets = [0, 64], sizes = [1, 32], strides = [1, 1]} : vector<1x128xf32> to vector<1x32xf32>
    %cst_46 = arith.constant 2.000000e+00 : f32
    %138 = vector.broadcast %cst_46 : f32 to vector<1x32xf32>
    %139 = arith.mulf %138, %137 : vector<1x32xf32>
    %cst_47 = arith.constant 1.000000e+00 : f32
    %140 = vector.broadcast %cst_47 : f32 to vector<1x32xf32>
    %141 = arith.subf %139, %140 : vector<1x32xf32>
    %142 = vector.extract_strided_slice %134 {offsets = [0, 96], sizes = [1, 32], strides = [1, 1]} : vector<1x128xf32> to vector<1x32xf32>
    %143 = arith.mulf %136, %98 : vector<1x32xf32>
    %144 = arith.mulf %135, %141 : vector<1x32xf32>
    %145 = arith.addf %143, %144 : vector<1x32xf32>
    %146 = math.tanh %145 : vector<1x32xf32>
    %147 = arith.mulf %142, %146 : vector<1x32xf32>
    %c2_48 = arith.constant 2 : index
    %c0_49 = arith.constant 0 : index
    %148 = vector.load %arg11[%c2_48, %c0_49] : memref<8x32xf32, #tpu.memory_space<vmem>>, vector<1x32xf32>
    tpu.vector_store %arg11[%c2_48, %c0_49], %147 {strides = array<i32>} : memref<8x32xf32, #tpu.memory_space<vmem>>, vector<1x32xf32>,
    %c3 = arith.constant 3 : index
    %c0_50 = arith.constant 0 : index
    %149 = vector.load %arg10[%c3, %c0_50] : memref<8x128xf32, #tpu.memory_space<vmem>>, vector<1x128xf32>
    %150 = vector.extract_strided_slice %127 {offsets = [0, 0], sizes = [1, 128], strides = [1, 1]} : vector<1x256xf32> to vector<1x128xf32>
    %151 = arith.addf %149, %150 : vector<1x128xf32>
    %152 = arith.negf %151 : vector<1x128xf32>
    %153 = math.exp %152 : vector<1x128xf32>
    %cst_51 = arith.constant 1.000000e+00 : f32
    %154 = vector.broadcast %cst_51 : f32 to vector<1x128xf32>
    %155 = arith.addf %154, %153 : vector<1x128xf32>
    %156 = arith.divf %154, %155 : vector<1x128xf32>
    %157 = vector.extract_strided_slice %156 {offsets = [0, 0], sizes = [1, 32], strides = [1, 1]} : vector<1x128xf32> to vector<1x32xf32>
    %158 = vector.extract_strided_slice %156 {offsets = [0, 32], sizes = [1, 32], strides = [1, 1]} : vector<1x128xf32> to vector<1x32xf32>
    %159 = vector.extract_strided_slice %156 {offsets = [0, 64], sizes = [1, 32], strides = [1, 1]} : vector<1x128xf32> to vector<1x32xf32>
    %cst_52 = arith.constant 2.000000e+00 : f32
    %160 = vector.broadcast %cst_52 : f32 to vector<1x32xf32>
    %161 = arith.mulf %160, %159 : vector<1x32xf32>
    %cst_53 = arith.constant 1.000000e+00 : f32
    %162 = vector.broadcast %cst_53 : f32 to vector<1x32xf32>
    %163 = arith.subf %161, %162 : vector<1x32xf32>
    %164 = vector.extract_strided_slice %156 {offsets = [0, 96], sizes = [1, 32], strides = [1, 1]} : vector<1x128xf32> to vector<1x32xf32>
    %165 = arith.mulf %158, %120 : vector<1x32xf32>
    %166 = arith.mulf %157, %163 : vector<1x32xf32>
    %167 = arith.addf %165, %166 : vector<1x32xf32>
    %168 = math.tanh %167 : vector<1x32xf32>
    %169 = arith.mulf %164, %168 : vector<1x32xf32>
    %c0_54 = arith.constant 0 : index
    %c0_55 = arith.constant 0 : index
    %170 = vector.load %arg3[%c0_54, %c0_55] : memref<64x256xbf16, #tpu.memory_space<vmem>>, vector<64x256xbf16>
    %c0_56 = arith.constant 0 : index
    %c0_57 = arith.constant 0 : index
    %171 = vector.load %arg4[%c0_56, %c0_57] : memref<1x128xf32, #tpu.memory_space<vmem>>, vector<1x128xf32>
    %172 = tpu.concatenate %169, %147 in 1 : vector<1x32xf32>, vector<1x32xf32> -> vector<1x64xf32>
    %173 = arith.truncf %172 : vector<1x64xf32> to vector<1x64xbf16>
    %cst_58 = arith.constant dense<0.000000e+00> : vector<1x256xf32>
    %174 = tpu.matmul %173, %170, %cst_58 {dimension_numbers = #tpu.dot_dimension_numbers<[1], [0], [0], [1], [0, 0, 1, 1], [], []>} : vector<1x64xbf16>, vector<64x256xbf16>, vector<1x256xf32> -> vector<1x256xf32>
    %175 = vector.extract_strided_slice %174 {offsets = [0, 128], sizes = [1, 128], strides = [1, 1]} : vector<1x256xf32> to vector<1x128xf32>
    %176 = arith.addf %175, %171 : vector<1x128xf32>
    %177 = arith.negf %176 : vector<1x128xf32>
    %178 = math.exp %177 : vector<1x128xf32>
    %cst_59 = arith.constant 1.000000e+00 : f32
    %179 = vector.broadcast %cst_59 : f32 to vector<1x128xf32>
    %180 = arith.addf %179, %178 : vector<1x128xf32>
    %181 = arith.divf %179, %180 : vector<1x128xf32>
    %182 = vector.extract_strided_slice %181 {offsets = [0, 0], sizes = [1, 32], strides = [1, 1]} : vector<1x128xf32> to vector<1x32xf32>
    %183 = vector.extract_strided_slice %181 {offsets = [0, 32], sizes = [1, 32], strides = [1, 1]} : vector<1x128xf32> to vector<1x32xf32>
    %184 = vector.extract_strided_slice %181 {offsets = [0, 64], sizes = [1, 32], strides = [1, 1]} : vector<1x128xf32> to vector<1x32xf32>
    %cst_60 = arith.constant 2.000000e+00 : f32
    %185 = vector.broadcast %cst_60 : f32 to vector<1x32xf32>
    %186 = arith.mulf %185, %184 : vector<1x32xf32>
    %cst_61 = arith.constant 1.000000e+00 : f32
    %187 = vector.broadcast %cst_61 : f32 to vector<1x32xf32>
    %188 = arith.subf %186, %187 : vector<1x32xf32>
    %189 = vector.extract_strided_slice %181 {offsets = [0, 96], sizes = [1, 32], strides = [1, 1]} : vector<1x128xf32> to vector<1x32xf32>
    %190 = arith.mulf %183, %145 : vector<1x32xf32>
    %191 = arith.mulf %182, %188 : vector<1x32xf32>
    %192 = arith.addf %190, %191 : vector<1x32xf32>
    %193 = math.tanh %192 : vector<1x32xf32>
    %194 = arith.mulf %189, %193 : vector<1x32xf32>
    %c3_62 = arith.constant 3 : index
    %c0_63 = arith.constant 0 : index
    %195 = vector.load %arg11[%c3_62, %c0_63] : memref<8x32xf32, #tpu.memory_space<vmem>>, vector<1x32xf32>
    tpu.vector_store %arg11[%c3_62, %c0_63], %194 {strides = array<i32>} : memref<8x32xf32, #tpu.memory_space<vmem>>, vector<1x32xf32>,
    %c4 = arith.constant 4 : index
    %c0_64 = arith.constant 0 : index
    %196 = vector.load %arg10[%c4, %c0_64] : memref<8x128xf32, #tpu.memory_space<vmem>>, vector<1x128xf32>
    %197 = vector.extract_strided_slice %174 {offsets = [0, 0], sizes = [1, 128], strides = [1, 1]} : vector<1x256xf32> to vector<1x128xf32>
    %198 = arith.addf %196, %197 : vector<1x128xf32>
    %199 = arith.negf %198 : vector<1x128xf32>
    %200 = math.exp %199 : vector<1x128xf32>
    %cst_65 = arith.constant 1.000000e+00 : f32
    %201 = vector.broadcast %cst_65 : f32 to vector<1x128xf32>
    %202 = arith.addf %201, %200 : vector<1x128xf32>
    %203 = arith.divf %201, %202 : vector<1x128xf32>
    %204 = vector.extract_strided_slice %203 {offsets = [0, 0], sizes = [1, 32], strides = [1, 1]} : vector<1x128xf32> to vector<1x32xf32>
    %205 = vector.extract_strided_slice %203 {offsets = [0, 32], sizes = [1, 32], strides = [1, 1]} : vector<1x128xf32> to vector<1x32xf32>
    %206 = vector.extract_strided_slice %203 {offsets = [0, 64], sizes = [1, 32], strides = [1, 1]} : vector<1x128xf32> to vector<1x32xf32>
    %cst_66 = arith.constant 2.000000e+00 : f32
    %207 = vector.broadcast %cst_66 : f32 to vector<1x32xf32>
    %208 = arith.mulf %207, %206 : vector<1x32xf32>
    %cst_67 = arith.constant 1.000000e+00 : f32
    %209 = vector.broadcast %cst_67 : f32 to vector<1x32xf32>
    %210 = arith.subf %208, %209 : vector<1x32xf32>
    %211 = vector.extract_strided_slice %203 {offsets = [0, 96], sizes = [1, 32], strides = [1, 1]} : vector<1x128xf32> to vector<1x32xf32>
    %212 = arith.mulf %205, %167 : vector<1x32xf32>
    %213 = arith.mulf %204, %210 : vector<1x32xf32>
    %214 = arith.addf %212, %213 : vector<1x32xf32>
    %215 = math.tanh %214 : vector<1x32xf32>
    %216 = arith.mulf %211, %215 : vector<1x32xf32>
    %c0_68 = arith.constant 0 : index
    %c0_69 = arith.constant 0 : index
    %217 = vector.load %arg3[%c0_68, %c0_69] : memref<64x256xbf16, #tpu.memory_space<vmem>>, vector<64x256xbf16>
    %c0_70 = arith.constant 0 : index
    %c0_71 = arith.constant 0 : index
    %218 = vector.load %arg4[%c0_70, %c0_71] : memref<1x128xf32, #tpu.memory_space<vmem>>, vector<1x128xf32>
    %219 = tpu.concatenate %216, %194 in 1 : vector<1x32xf32>, vector<1x32xf32> -> vector<1x64xf32>
    %220 = arith.truncf %219 : vector<1x64xf32> to vector<1x64xbf16>
    %cst_72 = arith.constant dense<0.000000e+00> : vector<1x256xf32>
    %221 = tpu.matmul %220, %217, %cst_72 {dimension_numbers = #tpu.dot_dimension_numbers<[1], [0], [0], [1], [0, 0, 1, 1], [], []>} : vector<1x64xbf16>, vector<64x256xbf16>, vector<1x256xf32> -> vector<1x256xf32>
    %222 = vector.extract_strided_slice %221 {offsets = [0, 128], sizes = [1, 128], strides = [1, 1]} : vector<1x256xf32> to vector<1x128xf32>
    %223 = arith.addf %222, %218 : vector<1x128xf32>
    %224 = arith.negf %223 : vector<1x128xf32>
    %225 = math.exp %224 : vector<1x128xf32>
    %cst_73 = arith.constant 1.000000e+00 : f32
    %226 = vector.broadcast %cst_73 : f32 to vector<1x128xf32>
    %227 = arith.addf %226, %225 : vector<1x128xf32>
    %228 = arith.divf %226, %227 : vector<1x128xf32>
    %229 = vector.extract_strided_slice %228 {offsets = [0, 0], sizes = [1, 32], strides = [1, 1]} : vector<1x128xf32> to vector<1x32xf32>
    %230 = vector.extract_strided_slice %228 {offsets = [0, 32], sizes = [1, 32], strides = [1, 1]} : vector<1x128xf32> to vector<1x32xf32>
    %231 = vector.extract_strided_slice %228 {offsets = [0, 64], sizes = [1, 32], strides = [1, 1]} : vector<1x128xf32> to vector<1x32xf32>
    %cst_74 = arith.constant 2.000000e+00 : f32
    %232 = vector.broadcast %cst_74 : f32 to vector<1x32xf32>
    %233 = arith.mulf %232, %231 : vector<1x32xf32>
    %cst_75 = arith.constant 1.000000e+00 : f32
    %234 = vector.broadcast %cst_75 : f32 to vector<1x32xf32>
    %235 = arith.subf %233, %234 : vector<1x32xf32>
    %236 = vector.extract_strided_slice %228 {offsets = [0, 96], sizes = [1, 32], strides = [1, 1]} : vector<1x128xf32> to vector<1x32xf32>
    %237 = arith.mulf %230, %192 : vector<1x32xf32>
    %238 = arith.mulf %229, %235 : vector<1x32xf32>
    %239 = arith.addf %237, %238 : vector<1x32xf32>
    %240 = math.tanh %239 : vector<1x32xf32>
    %241 = arith.mulf %236, %240 : vector<1x32xf32>
    %c4_76 = arith.constant 4 : index
    %c0_77 = arith.constant 0 : index
    %242 = vector.load %arg11[%c4_76, %c0_77] : memref<8x32xf32, #tpu.memory_space<vmem>>, vector<1x32xf32>
    tpu.vector_store %arg11[%c4_76, %c0_77], %241 {strides = array<i32>} : memref<8x32xf32, #tpu.memory_space<vmem>>, vector<1x32xf32>,
    %c5 = arith.constant 5 : index
    %c0_78 = arith.constant 0 : index
    %243 = vector.load %arg10[%c5, %c0_78] : memref<8x128xf32, #tpu.memory_space<vmem>>, vector<1x128xf32>
    %244 = vector.extract_strided_slice %221 {offsets = [0, 0], sizes = [1, 128], strides = [1, 1]} : vector<1x256xf32> to vector<1x128xf32>
    %245 = arith.addf %243, %244 : vector<1x128xf32>
    %246 = arith.negf %245 : vector<1x128xf32>
    %247 = math.exp %246 : vector<1x128xf32>
    %cst_79 = arith.constant 1.000000e+00 : f32
    %248 = vector.broadcast %cst_79 : f32 to vector<1x128xf32>
    %249 = arith.addf %248, %247 : vector<1x128xf32>
    %250 = arith.divf %248, %249 : vector<1x128xf32>
    %251 = vector.extract_strided_slice %250 {offsets = [0, 0], sizes = [1, 32], strides = [1, 1]} : vector<1x128xf32> to vector<1x32xf32>
    %252 = vector.extract_strided_slice %250 {offsets = [0, 32], sizes = [1, 32], strides = [1, 1]} : vector<1x128xf32> to vector<1x32xf32>
    %253 = vector.extract_strided_slice %250 {offsets = [0, 64], sizes = [1, 32], strides = [1, 1]} : vector<1x128xf32> to vector<1x32xf32>
    %cst_80 = arith.constant 2.000000e+00 : f32
    %254 = vector.broadcast %cst_80 : f32 to vector<1x32xf32>
    %255 = arith.mulf %254, %253 : vector<1x32xf32>
    %cst_81 = arith.constant 1.000000e+00 : f32
    %256 = vector.broadcast %cst_81 : f32 to vector<1x32xf32>
    %257 = arith.subf %255, %256 : vector<1x32xf32>
    %258 = vector.extract_strided_slice %250 {offsets = [0, 96], sizes = [1, 32], strides = [1, 1]} : vector<1x128xf32> to vector<1x32xf32>
    %259 = arith.mulf %252, %214 : vector<1x32xf32>
    %260 = arith.mulf %251, %257 : vector<1x32xf32>
    %261 = arith.addf %259, %260 : vector<1x32xf32>
    %262 = math.tanh %261 : vector<1x32xf32>
    %263 = arith.mulf %258, %262 : vector<1x32xf32>
    %c0_82 = arith.constant 0 : index
    %c0_83 = arith.constant 0 : index
    %264 = vector.load %arg3[%c0_82, %c0_83] : memref<64x256xbf16, #tpu.memory_space<vmem>>, vector<64x256xbf16>
    %c0_84 = arith.constant 0 : index
    %c0_85 = arith.constant 0 : index
    %265 = vector.load %arg4[%c0_84, %c0_85] : memref<1x128xf32, #tpu.memory_space<vmem>>, vector<1x128xf32>
    %266 = tpu.concatenate %263, %241 in 1 : vector<1x32xf32>, vector<1x32xf32> -> vector<1x64xf32>
    %267 = arith.truncf %266 : vector<1x64xf32> to vector<1x64xbf16>
    %cst_86 = arith.constant dense<0.000000e+00> : vector<1x256xf32>
    %268 = tpu.matmul %267, %264, %cst_86 {dimension_numbers = #tpu.dot_dimension_numbers<[1], [0], [0], [1], [0, 0, 1, 1], [], []>} : vector<1x64xbf16>, vector<64x256xbf16>, vector<1x256xf32> -> vector<1x256xf32>
    %269 = vector.extract_strided_slice %268 {offsets = [0, 128], sizes = [1, 128], strides = [1, 1]} : vector<1x256xf32> to vector<1x128xf32>
    %270 = arith.addf %269, %265 : vector<1x128xf32>
    %271 = arith.negf %270 : vector<1x128xf32>
    %272 = math.exp %271 : vector<1x128xf32>
    %cst_87 = arith.constant 1.000000e+00 : f32
    %273 = vector.broadcast %cst_87 : f32 to vector<1x128xf32>
    %274 = arith.addf %273, %272 : vector<1x128xf32>
    %275 = arith.divf %273, %274 : vector<1x128xf32>
    %276 = vector.extract_strided_slice %275 {offsets = [0, 0], sizes = [1, 32], strides = [1, 1]} : vector<1x128xf32> to vector<1x32xf32>
    %277 = vector.extract_strided_slice %275 {offsets = [0, 32], sizes = [1, 32], strides = [1, 1]} : vector<1x128xf32> to vector<1x32xf32>
    %278 = vector.extract_strided_slice %275 {offsets = [0, 64], sizes = [1, 32], strides = [1, 1]} : vector<1x128xf32> to vector<1x32xf32>
    %cst_88 = arith.constant 2.000000e+00 : f32
    %279 = vector.broadcast %cst_88 : f32 to vector<1x32xf32>
    %280 = arith.mulf %279, %278 : vector<1x32xf32>
    %cst_89 = arith.constant 1.000000e+00 : f32
    %281 = vector.broadcast %cst_89 : f32 to vector<1x32xf32>
    %282 = arith.subf %280, %281 : vector<1x32xf32>
    %283 = vector.extract_strided_slice %275 {offsets = [0, 96], sizes = [1, 32], strides = [1, 1]} : vector<1x128xf32> to vector<1x32xf32>
    %284 = arith.mulf %277, %239 : vector<1x32xf32>
    %285 = arith.mulf %276, %282 : vector<1x32xf32>
    %286 = arith.addf %284, %285 : vector<1x32xf32>
    %287 = math.tanh %286 : vector<1x32xf32>
    %288 = arith.mulf %283, %287 : vector<1x32xf32>
    %c5_90 = arith.constant 5 : index
    %c0_91 = arith.constant 0 : index
    %289 = vector.load %arg11[%c5_90, %c0_91] : memref<8x32xf32, #tpu.memory_space<vmem>>, vector<1x32xf32>
    tpu.vector_store %arg11[%c5_90, %c0_91], %288 {strides = array<i32>} : memref<8x32xf32, #tpu.memory_space<vmem>>, vector<1x32xf32>,
    %c6 = arith.constant 6 : index
    %c0_92 = arith.constant 0 : index
    %290 = vector.load %arg10[%c6, %c0_92] : memref<8x128xf32, #tpu.memory_space<vmem>>, vector<1x128xf32>
    %291 = vector.extract_strided_slice %268 {offsets = [0, 0], sizes = [1, 128], strides = [1, 1]} : vector<1x256xf32> to vector<1x128xf32>
    %292 = arith.addf %290, %291 : vector<1x128xf32>
    %293 = arith.negf %292 : vector<1x128xf32>
    %294 = math.exp %293 : vector<1x128xf32>
    %cst_93 = arith.constant 1.000000e+00 : f32
    %295 = vector.broadcast %cst_93 : f32 to vector<1x128xf32>
    %296 = arith.addf %295, %294 : vector<1x128xf32>
    %297 = arith.divf %295, %296 : vector<1x128xf32>
    %298 = vector.extract_strided_slice %297 {offsets = [0, 0], sizes = [1, 32], strides = [1, 1]} : vector<1x128xf32> to vector<1x32xf32>
    %299 = vector.extract_strided_slice %297 {offsets = [0, 32], sizes = [1, 32], strides = [1, 1]} : vector<1x128xf32> to vector<1x32xf32>
    %300 = vector.extract_strided_slice %297 {offsets = [0, 64], sizes = [1, 32], strides = [1, 1]} : vector<1x128xf32> to vector<1x32xf32>
    %cst_94 = arith.constant 2.000000e+00 : f32
    %301 = vector.broadcast %cst_94 : f32 to vector<1x32xf32>
    %302 = arith.mulf %301, %300 : vector<1x32xf32>
    %cst_95 = arith.constant 1.000000e+00 : f32
    %303 = vector.broadcast %cst_95 : f32 to vector<1x32xf32>
    %304 = arith.subf %302, %303 : vector<1x32xf32>
    %305 = vector.extract_strided_slice %297 {offsets = [0, 96], sizes = [1, 32], strides = [1, 1]} : vector<1x128xf32> to vector<1x32xf32>
    %306 = arith.mulf %299, %261 : vector<1x32xf32>
    %307 = arith.mulf %298, %304 : vector<1x32xf32>
    %308 = arith.addf %306, %307 : vector<1x32xf32>
    %309 = math.tanh %308 : vector<1x32xf32>
    %310 = arith.mulf %305, %309 : vector<1x32xf32>
    %c0_96 = arith.constant 0 : index
    %c0_97 = arith.constant 0 : index
    %311 = vector.load %arg3[%c0_96, %c0_97] : memref<64x256xbf16, #tpu.memory_space<vmem>>, vector<64x256xbf16>
    %c0_98 = arith.constant 0 : index
    %c0_99 = arith.constant 0 : index
    %312 = vector.load %arg4[%c0_98, %c0_99] : memref<1x128xf32, #tpu.memory_space<vmem>>, vector<1x128xf32>
    %313 = tpu.concatenate %310, %288 in 1 : vector<1x32xf32>, vector<1x32xf32> -> vector<1x64xf32>
    %314 = arith.truncf %313 : vector<1x64xf32> to vector<1x64xbf16>
    %cst_100 = arith.constant dense<0.000000e+00> : vector<1x256xf32>
    %315 = tpu.matmul %314, %311, %cst_100 {dimension_numbers = #tpu.dot_dimension_numbers<[1], [0], [0], [1], [0, 0, 1, 1], [], []>} : vector<1x64xbf16>, vector<64x256xbf16>, vector<1x256xf32> -> vector<1x256xf32>
    %316 = vector.extract_strided_slice %315 {offsets = [0, 128], sizes = [1, 128], strides = [1, 1]} : vector<1x256xf32> to vector<1x128xf32>
    %317 = arith.addf %316, %312 : vector<1x128xf32>
    %318 = arith.negf %317 : vector<1x128xf32>
    %319 = math.exp %318 : vector<1x128xf32>
    %cst_101 = arith.constant 1.000000e+00 : f32
    %320 = vector.broadcast %cst_101 : f32 to vector<1x128xf32>
    %321 = arith.addf %320, %319 : vector<1x128xf32>
    %322 = arith.divf %320, %321 : vector<1x128xf32>
    %323 = vector.extract_strided_slice %322 {offsets = [0, 0], sizes = [1, 32], strides = [1, 1]} : vector<1x128xf32> to vector<1x32xf32>
    %324 = vector.extract_strided_slice %322 {offsets = [0, 32], sizes = [1, 32], strides = [1, 1]} : vector<1x128xf32> to vector<1x32xf32>
    %325 = vector.extract_strided_slice %322 {offsets = [0, 64], sizes = [1, 32], strides = [1, 1]} : vector<1x128xf32> to vector<1x32xf32>
    %cst_102 = arith.constant 2.000000e+00 : f32
    %326 = vector.broadcast %cst_102 : f32 to vector<1x32xf32>
    %327 = arith.mulf %326, %325 : vector<1x32xf32>
    %cst_103 = arith.constant 1.000000e+00 : f32
    %328 = vector.broadcast %cst_103 : f32 to vector<1x32xf32>
    %329 = arith.subf %327, %328 : vector<1x32xf32>
    %330 = vector.extract_strided_slice %322 {offsets = [0, 96], sizes = [1, 32], strides = [1, 1]} : vector<1x128xf32> to vector<1x32xf32>
    %331 = arith.mulf %324, %286 : vector<1x32xf32>
    %332 = arith.mulf %323, %329 : vector<1x32xf32>
    %333 = arith.addf %331, %332 : vector<1x32xf32>
    %334 = math.tanh %333 : vector<1x32xf32>
    %335 = arith.mulf %330, %334 : vector<1x32xf32>
    %c6_104 = arith.constant 6 : index
    %c0_105 = arith.constant 0 : index
    %336 = vector.load %arg11[%c6_104, %c0_105] : memref<8x32xf32, #tpu.memory_space<vmem>>, vector<1x32xf32>
    tpu.vector_store %arg11[%c6_104, %c0_105], %335 {strides = array<i32>} : memref<8x32xf32, #tpu.memory_space<vmem>>, vector<1x32xf32>,
    %c7 = arith.constant 7 : index
    %c0_106 = arith.constant 0 : index
    %337 = vector.load %arg10[%c7, %c0_106] : memref<8x128xf32, #tpu.memory_space<vmem>>, vector<1x128xf32>
    %338 = vector.extract_strided_slice %315 {offsets = [0, 0], sizes = [1, 128], strides = [1, 1]} : vector<1x256xf32> to vector<1x128xf32>
    %339 = arith.addf %337, %338 : vector<1x128xf32>
    %340 = arith.negf %339 : vector<1x128xf32>
    %341 = math.exp %340 : vector<1x128xf32>
    %cst_107 = arith.constant 1.000000e+00 : f32
    %342 = vector.broadcast %cst_107 : f32 to vector<1x128xf32>
    %343 = arith.addf %342, %341 : vector<1x128xf32>
    %344 = arith.divf %342, %343 : vector<1x128xf32>
    %345 = vector.extract_strided_slice %344 {offsets = [0, 0], sizes = [1, 32], strides = [1, 1]} : vector<1x128xf32> to vector<1x32xf32>
    %346 = vector.extract_strided_slice %344 {offsets = [0, 32], sizes = [1, 32], strides = [1, 1]} : vector<1x128xf32> to vector<1x32xf32>
    %347 = vector.extract_strided_slice %344 {offsets = [0, 64], sizes = [1, 32], strides = [1, 1]} : vector<1x128xf32> to vector<1x32xf32>
    %cst_108 = arith.constant 2.000000e+00 : f32
    %348 = vector.broadcast %cst_108 : f32 to vector<1x32xf32>
    %349 = arith.mulf %348, %347 : vector<1x32xf32>
    %cst_109 = arith.constant 1.000000e+00 : f32
    %350 = vector.broadcast %cst_109 : f32 to vector<1x32xf32>
    %351 = arith.subf %349, %350 : vector<1x32xf32>
    %352 = vector.extract_strided_slice %344 {offsets = [0, 96], sizes = [1, 32], strides = [1, 1]} : vector<1x128xf32> to vector<1x32xf32>
    %353 = arith.mulf %346, %308 : vector<1x32xf32>
    %354 = arith.mulf %345, %351 : vector<1x32xf32>
    %355 = arith.addf %353, %354 : vector<1x32xf32>
    %356 = math.tanh %355 : vector<1x32xf32>
    %357 = arith.mulf %352, %356 : vector<1x32xf32>
    %c0_110 = arith.constant 0 : index
    %c0_111 = arith.constant 0 : index
    %358 = vector.load %arg3[%c0_110, %c0_111] : memref<64x256xbf16, #tpu.memory_space<vmem>>, vector<64x256xbf16>
    %c0_112 = arith.constant 0 : index
    %c0_113 = arith.constant 0 : index
    %359 = vector.load %arg4[%c0_112, %c0_113] : memref<1x128xf32, #tpu.memory_space<vmem>>, vector<1x128xf32>
    %360 = tpu.concatenate %357, %335 in 1 : vector<1x32xf32>, vector<1x32xf32> -> vector<1x64xf32>
    %361 = arith.truncf %360 : vector<1x64xf32> to vector<1x64xbf16>
    %cst_114 = arith.constant dense<0.000000e+00> : vector<1x256xf32>
    %362 = tpu.matmul %361, %358, %cst_114 {dimension_numbers = #tpu.dot_dimension_numbers<[1], [0], [0], [1], [0, 0, 1, 1], [], []>} : vector<1x64xbf16>, vector<64x256xbf16>, vector<1x256xf32> -> vector<1x256xf32>
    %363 = vector.extract_strided_slice %362 {offsets = [0, 128], sizes = [1, 128], strides = [1, 1]} : vector<1x256xf32> to vector<1x128xf32>
    %364 = arith.addf %363, %359 : vector<1x128xf32>
    %365 = arith.negf %364 : vector<1x128xf32>
    %366 = math.exp %365 : vector<1x128xf32>
    %cst_115 = arith.constant 1.000000e+00 : f32
    %367 = vector.broadcast %cst_115 : f32 to vector<1x128xf32>
    %368 = arith.addf %367, %366 : vector<1x128xf32>
    %369 = arith.divf %367, %368 : vector<1x128xf32>
    %370 = vector.extract_strided_slice %369 {offsets = [0, 0], sizes = [1, 32], strides = [1, 1]} : vector<1x128xf32> to vector<1x32xf32>
    %371 = vector.extract_strided_slice %369 {offsets = [0, 32], sizes = [1, 32], strides = [1, 1]} : vector<1x128xf32> to vector<1x32xf32>
    %372 = vector.extract_strided_slice %369 {offsets = [0, 64], sizes = [1, 32], strides = [1, 1]} : vector<1x128xf32> to vector<1x32xf32>
    %cst_116 = arith.constant 2.000000e+00 : f32
    %373 = vector.broadcast %cst_116 : f32 to vector<1x32xf32>
    %374 = arith.mulf %373, %372 : vector<1x32xf32>
    %cst_117 = arith.constant 1.000000e+00 : f32
    %375 = vector.broadcast %cst_117 : f32 to vector<1x32xf32>
    %376 = arith.subf %374, %375 : vector<1x32xf32>
    %377 = vector.extract_strided_slice %369 {offsets = [0, 96], sizes = [1, 32], strides = [1, 1]} : vector<1x128xf32> to vector<1x32xf32>
    %378 = arith.mulf %371, %333 : vector<1x32xf32>
    %379 = arith.mulf %370, %376 : vector<1x32xf32>
    %380 = arith.addf %378, %379 : vector<1x32xf32>
    %381 = math.tanh %380 : vector<1x32xf32>
    %382 = arith.mulf %377, %381 : vector<1x32xf32>
    %c7_118 = arith.constant 7 : index
    %c0_119 = arith.constant 0 : index
    %383 = vector.load %arg11[%c7_118, %c0_119] : memref<8x32xf32, #tpu.memory_space<vmem>>, vector<1x32xf32>
    tpu.vector_store %arg11[%c7_118, %c0_119], %382 {strides = array<i32>} : memref<8x32xf32, #tpu.memory_space<vmem>>, vector<1x32xf32>,
    %c0_120 = arith.constant 0 : index
    %c0_121 = arith.constant 0 : index
    %384 = vector.load %arg11[%c0_120, %c0_121] : memref<8x32xf32, #tpu.memory_space<vmem>>, vector<8x32xf32>
    %c0_122 = arith.constant 0 : index
    %c0_123 = arith.constant 0 : index
    %385 = vector.load %arg5[%c0_122, %c0_123] : memref<1x32xf32, #tpu.memory_space<vmem>>, vector<1x32xf32>
    %386 = vector.broadcast %385 : vector<1x32xf32> to vector<8x32xf32>
    %387 = arith.mulf %384, %386 : vector<8x32xf32>
    %cst_124 = arith.constant dense<0.000000e+00> : vector<8xf32>
    %388 = vector.multi_reduction <add>, %387, %cst_124 [1] : vector<8x32xf32> to vector<8xf32>
    %389 = vector.shape_cast %388 : vector<8xf32> to vector<8x1xf32>
    %c0_125 = arith.constant 0 : index
    %c0_126 = arith.constant 0 : index
    %390 = vector.load %arg6[%c0_125, %c0_126] : memref<1x1xf32, #tpu.memory_space<vmem>>, vector<1x1xf32>
    %391 = vector.broadcast %390 : vector<1x1xf32> to vector<8x1xf32>
    %392 = arith.addf %389, %391 : vector<8x1xf32>
    %c0_127 = arith.constant 0 : index
    %c0_128 = arith.constant 0 : index
    %393 = vector.load %arg7[%c0_127, %c0_128] : memref<8x1xf32, #tpu.memory_space<vmem>>, vector<8x1xf32>
    tpu.vector_store %arg7[%c0_127, %c0_128], %392 {strides = array<i32>} : memref<8x1xf32, #tpu.memory_space<vmem>>, vector<8x1xf32>,
    %c0_129 = arith.constant 0 : index
    %c0_130 = arith.constant 0 : index
    %394 = vector.load %arg8[%c0_129, %c0_130] : memref<2x32xf32, #tpu.memory_space<vmem>>, vector<1x32xf32>
    tpu.vector_store %arg8[%c0_129, %c0_130], %357 {strides = array<i32>} : memref<2x32xf32, #tpu.memory_space<vmem>>, vector<1x32xf32>,
    %c1_131 = arith.constant 1 : index
    %c0_132 = arith.constant 0 : index
    %395 = vector.load %arg8[%c1_131, %c0_132] : memref<2x32xf32, #tpu.memory_space<vmem>>, vector<1x32xf32>
    tpu.vector_store %arg8[%c1_131, %c0_132], %382 {strides = array<i32>} : memref<2x32xf32, #tpu.memory_space<vmem>>, vector<1x32xf32>,
    %c0_133 = arith.constant 0 : index
    %c0_134 = arith.constant 0 : index
    %396 = vector.load %arg9[%c0_133, %c0_134] : memref<2x32xf32, #tpu.memory_space<vmem>>, vector<1x32xf32>
    tpu.vector_store %arg9[%c0_133, %c0_134], %355 {strides = array<i32>} : memref<2x32xf32, #tpu.memory_space<vmem>>, vector<1x32xf32>,
    %c1_135 = arith.constant 1 : index
    %c0_136 = arith.constant 0 : index
    %397 = vector.load %arg9[%c1_135, %c0_136] : memref<2x32xf32, #tpu.memory_space<vmem>>, vector<1x32xf32>
    tpu.vector_store %arg9[%c1_135, %c0_136], %380 {strides = array<i32>} : memref<2x32xf32, #tpu.memory_space<vmem>>, vector<1x32xf32>,
    return
  }
}

</mosaic_0001>

<bundles_post_ra>
// kernel: tpu_custom_call.1
= control target key start
LH: loop header
LB: loop body
LE: loop exit
PB: predicated region body
PF: predicated region fallthrough
CT: control target
= control target key end

     0   :  { %s2076_s0 = inlined_call_operand.vmem [shape: f32[8,1], index: 0, kind: input, shape index: {}]   ;;  %s2077_s1 = inlined_call_operand.vmem [shape: f32[1,128], index: 1, kind: input, shape index: {}]   ;;  %s2078_s2 = inlined_call_operand.vmem [shape: f32[1,128], index: 2, kind: input, shape index: {}]   ;;  %s2079_s3 = inlined_call_operand.hbm [shape: bf16[64,256], index: 3, kind: input, shape index: {}]   ;;  %s2080_s4 = inlined_call_operand.vmem [shape: f32[1,128], index: 4, kind: input, shape index: {}]   ;;  %s2081_s5 = inlined_call_operand.vmem [shape: f32[1,32], index: 5, kind: input, shape index: {}]   ;;  %s2082_s6 = inlined_call_operand.<no memory space> [shape: f32[1,1], index: 6, kind: input, shape index: {}]   ;;  %s2083_s7 = inlined_call_operand.vmem [shape: f32[8,1], index: 7, kind: output, shape index: {0}]   ;;  %s2084_s8 = inlined_call_operand.hbm [shape: f32[2,32], index: 8, kind: output, shape index: {1}]   ;;  %s2085_s9 = inlined_call_operand.hbm [shape: f32[2,32], index: 9, kind: output, shape index: {2}]  }
   0x1   :  { %v15_v0 = vstv %s2082_s6 }
   0x2   :  { %16 = vst [vmem:[#allocation4] sm:$0x1] %v15_v0 }
   0x3   :  { %17 = vsyncpa [#allocation6], 0 }
   0x4   :  { %18 = vsyncpa [#allocation7], 0 }
   0x5   :  { %19 = vsyncpa [#allocation10], 0  ;;  %s1726_s11 = smov [#allocation5]   ;;  %s1654_s15 = scalar_lea.hbm %s2079_s3, 1024 }
   0x6   :  { %s31_s12 = sshll.u32 %s1726_s11, 4  ;;  %p1655_p0 = scmp.ne.s32.totalorder %s2079_s3, %s1654_s15  ;;  %s32_s12 = int_to_ptr.vmem [resolvable:$true] %s31_s12 }
   0x7   :  { %p1658_p1 = scmp.lt.u32.totalorder %s1654_s15, %s2079_s3 }
   0x9   :  { %p1660_p2 = pnand %p1658_p1, %p1655_p0 }
   0xb   :  { %1663 = shalt.err (!%p1660_p2)
}
   0xc   :  { %s1664_s6 = scalar_lea.vmem %s32_s12, 1024  ;;  %p1669_p4 = scmp.lt.s32.totalorder %s32_s12, %s32_s12 }
   0xd   :  { %p1665_p3 = scmp.ne.s32.totalorder %s32_s12, %s1664_s6  ;;  %p1670_p5 = scmp.lt.s32.totalorder %s1664_s6, %s1664_s6 }
   0xf   :  { %p1671_p6 = por %p1670_p5, %p1669_p4 }
  0x11   :  { %p1672_p7 = pnand %p1671_p6, %p1665_p3 }
  0x13   :  { %1675 = shalt.err (!%p1672_p7)
}
  0x14   :  { %s1727_s20 = smov 128   ;;  %s1728_s21 = smov 8  }
  0x15   :  { %37 = dma.hbm_to_vmem [thread:$0]  %s2079_s3, 1024, %s32_s12, [#allocation6], %s1727_s20, %s1727_s20, %s1728_s21  }
  0x16   :  { %1720 = dma.done.wait [#allocation6], 1024  }
  0x17   :  { %1721 = vsyncadd [#allocation6], 4294966272  ;;  %v1729_v1 = vmov 0   ;;  %v48_v2 = vld [vmem:[%s2076_s0] sm:$0xff]  ;;  %s1730_s0 = smov 64   ;;  %vm110_vm0 = vcmask 261120  }
  0x18   :  { %1533 = vset.pattern.permute.xlu0 %v1729_v1  ;;  %189 = vmatprep.mubr.bf16.mxu0 %v1729_v1  ;;  %v1416_v3 = vld [vmem:[%s2077_s1] ss:$0 sm:$0xff]  ;;  %s1731_s1 = smov 32   ;;  %v1819_v21 = vld [vmem:[#allocation5] ss:$8 sps:$4 sm:$0xff]   ;;  %vm153_vm1 = vcmask 523264  }
  0x19   :  { %350 = vmatprep.mubr.bf16.mxu1 %v1729_v1  ;;  %52 = vperm.xlu0 %1533, %v48_v2   ;;  %v1417_v4 = vld [vmem:[%s2078_s2] ss:$0 sm:$0xff]  ;;  %v1821_v22 = vld [vmem:[#allocation5 + $0x14] ss:$8 sps:$4 sm:$0xff]   ;;  %v1826_v23 = vld [vmem:[#allocation5 + $0x10] ss:$8 sps:$4 sm:$0xff]  }
  0x1a   :  { %v1817_v20 = vld [vmem:[#allocation5 + $0x4] ss:$8 sps:$4 sm:$0xff]   ;;  %v1834_v25 = vld [vmem:[#allocation5 + $0x20] ss:$8 sps:$4 sm:$0xff]   ;;  %v1838_v26 = vld [vmem:[#allocation5 + $0x34] ss:$8 sps:$4 sm:$0xff]  }
  0x1b   :  { %157 = vmatprep.subr.bf16.mxu0 %v1817_v20  ;;  %318 = vmatprep.subr.bf16.mxu1 %v1817_v20  ;;  %v1830_v24 = vld [vmem:[#allocation5 + $0x24] ss:$8 sps:$4 sm:$0xff]   ;;  %v1846_v28 = vld [vmem:[#allocation5 + $0x30] ss:$8 sps:$4 sm:$0xff]   ;;  %vm228_vm2 = vcmask 253952   ;;  %s1733_s24 = smov [#allocation8]  }
  0x1c   :  { %158 = vmatpush1.bf16.msra.mxu0 %v1819_v21  ;;  %319 = vmatpush1.bf16.msra.mxu1 %v1819_v21  ;;  %v105_v34 = vld [vmem:[%s2080_s4] sm:$0x1]  ;;  %s1391_s25 = sshll.u32 %s1733_s24, 4  ;;  %s1734_s26 = smov [#allocation9]   ;;  %s1392_s25 = int_to_ptr.vmem [resolvable:$true] %s1391_s25 }
  0x1d   :  { %159 = vmatprep.subr.bf16.mxu0 %v1821_v22  ;;  %320 = vmatprep.subr.bf16.mxu1 %v1821_v22  ;;  %s1401_s27 = sshll.u32 %s1734_s26, 4  ;;  %s1676_s28 = scalar_lea.vmem %s1392_s25, 32  ;;  %s1402_s27 = int_to_ptr.vmem [resolvable:$true] %s1401_s27 }
  0x1e   :  { %p1677_p8 = scmp.ne.s32.totalorder %s1392_s25, %s1676_s28  ;;  %p1681_p9 = scmp.lt.s32.totalorder %s1392_s25, %s1392_s25 }
  0x1f   :  { %p1682_p10 = scmp.lt.s32.totalorder %s1676_s28, %s1676_s28 }
  0x20   :  { %160 = vmatpush1.bf16.msra.mxu0 %v1826_v23  ;;  %321 = vmatpush1.bf16.msra.mxu1 %v1826_v23 }
  0x21   :  { %161 = vmatprep.subr.bf16.mxu0 %v1830_v24  ;;  %322 = vmatprep.subr.bf16.mxu1 %v1830_v24  ;;  %p1683_p11 = por %p1682_p10, %p1681_p9 }
  0x23   :  { %p1684_p12 = pnand %p1683_p11, %p1677_p8 }
  0x24   :  { %162 = vmatpush1.bf16.msra.mxu0 %v1834_v25  ;;  %323 = vmatpush1.bf16.msra.mxu1 %v1834_v25 }
  0x25   :  { %163 = vmatprep.subr.bf16.mxu0 %v1838_v26  ;;  %324 = vmatprep.subr.bf16.mxu1 %v1838_v26 }
  0x28   :  { %164 = vmatpush1.bf16.msra.mxu0 %v1846_v28  ;;  %325 = vmatpush1.bf16.msra.mxu1 %v1846_v28 }
  0x29   :  { %478 = vmatprep.subr.bf16.mxu0 %v1817_v20  ;;  %638 = vmatprep.subr.bf16.mxu1 %v1817_v20 }
  0x98   :  { %v53_v5 = vpop.permute.xlu0 %52 }
  0x99   :  { %v61_v6 = vmul.f32 %v1416_v3, %v53_v5 }
  0x9b   :  { %v69_v7 = vadd.f32 %v1417_v4, %v61_v6 }
  0x9d   :  { %70 = vst [vmem:[#allocation2] sm:$0xff] %v69_v7 }
  0xa4   :  { %v71_v8 = vld [vmem:[#allocation2] sm:$0x1]  ;;  %v230_v36 = vld [vmem:[#allocation2 + $0x1] sm:$0x1] }
  0xa5   :  { %v1418_v9 = vmul.f32 -1.442695, %v71_v8 }
  0xa7   :  { %1558 = vpow2.f32 %v1418_v9 }
  0xb1   :  { %v1559_v10 = vpop.eup %1558 }
  0xb2   :  { %v75_v11 = vadd.f32 1.0, %v1559_v10 }
  0xb4   :  { %1560 = vrcp.f32 %v75_v11  ;;  %v265_v11 = vld [vmem:[%s2080_s4] sm:$0x1] }
  0xbe   :  { %v1561_v12 = vpop.eup %1560 }
  0xbf   :  { %v78_v13 = vmul.f32 2.0, %v1561_v12  ;;  %v80_v17 = vmul.f32 0.0, %v1561_v12 }
  0xc1   :  { %v1419_v14 = vadd.f32 -1.0, %v78_v13  ;;  %v390_v13 = vld [vmem:[#allocation2 + $0x2] sm:$0x1] }
  0xc3   :  { %82 = vrot.lane.b32.xlu0 %v1419_v14, %s1730_s0 }
 0x135   :  { %v83_v15 = vpop.permute.xlu0 %82 }
 0x136   :  { %v85_v16 = vmul.f32 %v1561_v12, %v83_v15 }
 0x138   :  { %87 = vrot.lane.b32.xlu1 %v85_v16, %s1731_s1 }
 0x1aa   :  { %v88_v18 = vpop.permute.xlu1 %87 }
 0x1ab   :  { %v1814_v19 = vadd.f32 %v88_v18, %v80_v17 }
 0x1ad   :  { %1562 = vtanh.f32 %v1814_v19 }
 0x1b7   :  { %v1563_v27 = vpop.eup %1562 }
 0x1b8   :  { %93 = vrot.lane.b32.xlu1 %v1563_v27, %s1730_s0 }
 0x22a   :  { %v94_v29 = vpop.permute.xlu1 %93 }
 0x22b   :  { %v96_v30 = vmul.f32 %v1561_v12, %v94_v29 }
 0x22d   :  { %107 = vrot.lane.b32.xlu0 %v96_v30, %s1731_s1 }
 0x29f   :  { %v108_v31 = vpop.permute.xlu0 %107 }
 0x2a0   :  { %v111_v32 = vsel %vm110_vm0, %v108_v31, 0.0 }
 0x2a1   :  { %v112_v33 = vpack.c.bf16 %v111_v32, %v111_v32 }
 0x2a3   :  { %1428 = vmatmul.mubr.msk.bf16.vlgmr.msra.gmra.mrb[0].mxu0 %vm153_vm1, %v112_v33 }
 0x2a4   :  { %479 = vmatpush1.bf16.msra.mxu0 %v1819_v21  ;;  %510 = vmatprep.mubr.bf16.mxu0 %v1729_v1 }
 0x2a5   :  { %480 = vmatprep.subr.bf16.mxu0 %v1821_v22 }
 0x2a8   :  { %481 = vmatpush1.bf16.msra.mxu0 %v1826_v23 }
 0x2a9   :  { %482 = vmatprep.subr.bf16.mxu0 %v1830_v24 }
 0x2ac   :  { %483 = vmatpush1.bf16.msra.mxu0 %v1834_v25 }
 0x2ad   :  { %484 = vmatprep.subr.bf16.mxu0 %v1838_v26 }
 0x2b0   :  { %485 = vmatpush1.bf16.msra.mxu0 %v1846_v28 }
 0x2b1   :  { %798 = vmatprep.subr.bf16.mxu0 %v1817_v20 }
 0x376   :  { %v191_v35 = vpop.f32.mrb[0].mxu0 }
 0x377   :  { %v231_v37 = vadd.f32 %v230_v36, %v191_v35  ;;  %v193_v38 = vpop.f32.mrb[1].mxu0 }
 0x378   :  { %v198_v39 = vadd.f32 %v193_v38, %v105_v34  ;;  %v195_v40 = vpop.f32.mrb[2].mxu0 }
 0x379   :  { %v1431_v41 = vmul.f32 -1.442695, %v231_v37  ;;  %v196_v42 = vpop.f32.mrb[3].mxu0 }
 0x37a   :  { %v1429_v43 = vmul.f32 -1.442695, %v198_v39 }
 0x37b   :  { %1564 = vpow2.f32 %v1431_v41 }
 0x37c   :  { %1566 = vpow2.f32 %v1429_v43 }
 0x385   :  { %v1565_v44 = vpop.eup %1564 }
 0x386   :  { %v1567_v45 = vpop.eup %1566  ;;  %v235_v46 = vadd.f32 1.0, %v1565_v44 }
 0x387   :  { %v202_v47 = vadd.f32 1.0, %v1567_v45 }
 0x388   :  { %1568 = vrcp.f32 %v235_v46 }
 0x389   :  { %1570 = vrcp.f32 %v202_v47 }
 0x392   :  { %v1569_v48 = vpop.eup %1568 }
 0x393   :  { %v1571_v49 = vpop.eup %1570  ;;  %v238_v50 = vmul.f32 2.0, %v1569_v48  ;;  %v240_v58 = vmul.f32 %v1569_v48, %v1814_v19 }
 0x394   :  { %v205_v51 = vmul.f32 2.0, %v1571_v49  ;;  %v207_v60 = vmul.f32 0.0, %v1571_v49 }
 0x395   :  { %v1432_v52 = vadd.f32 -1.0, %v238_v50 }
 0x396   :  { %v1430_v53 = vadd.f32 -1.0, %v205_v51 }
 0x397   :  { %242 = vrot.lane.b32.xlu0 %v1432_v52, %s1730_s0 }
 0x398   :  { %209 = vrot.lane.b32.xlu1 %v1430_v53, %s1730_s0 }
 0x409   :  { %v243_v54 = vpop.permute.xlu0 %242 }
 0x40a   :  { %v245_v55 = vmul.f32 %v1569_v48, %v243_v54  ;;  %v210_v56 = vpop.permute.xlu1 %209 }
 0x40b   :  { %v212_v57 = vmul.f32 %v1571_v49, %v210_v56 }
 0x40c   :  { %247 = vrot.lane.b32.xlu0 %v245_v55, %s1731_s1 }
 0x40d   :  { %214 = vrot.lane.b32.xlu1 %v212_v57, %s1731_s1 }
 0x47e   :  { %v248_v59 = vpop.permute.xlu0 %247 }
 0x47f   :  { %v250_v61 = vadd.f32 %v248_v59, %v240_v58  ;;  %v215_v62 = vpop.permute.xlu1 %214  ;;  %v425_v59 = vld [vmem:[%s2080_s4] sm:$0x1] }
 0x480   :  { %v217_v63 = vadd.f32 %v215_v62, %v207_v60 }
 0x481   :  { %1572 = vtanh.f32 %v250_v61 }
 0x482   :  { %1574 = vtanh.f32 %v217_v63 }
 0x48b   :  { %v1573_v0 = vpop.eup %1572 }
 0x48c   :  { %v1575_v2 = vpop.eup %1574  ;;  %253 = vrot.lane.b32.xlu0 %v1573_v0, %s1730_s0 }
 0x48d   :  { %220 = vrot.lane.b32.xlu1 %v1575_v2, %s1730_s0 }
 0x4fe   :  { %v254_v3 = vpop.permute.xlu0 %253 }
 0x4ff   :  { %v256_v4 = vmul.f32 %v1569_v48, %v254_v3  ;;  %v221_v5 = vpop.permute.xlu1 %220 }
 0x500   :  { %v1874_v6 = vmul.f32 %v1571_v49, %v221_v5 }
 0x501   :  { %267 = vrot.lane.b32.xlu1 %v256_v4, %s1731_s1 }
 0x502   :  { %270 = vrot.lane.b32.xlu0 %v1874_v6, %s1730_s0 }
 0x573   :  { %v268_v7 = vpop.permute.xlu1 %267 }
 0x574   :  { %v271_v8 = vpop.permute.xlu0 %270 }
 0x575   :  { %v273_v9 = vsel %vm110_vm0, %v268_v7, %v271_v8 }
 0x576   :  { %v274_v10 = vpack.c.bf16 %v273_v9, %v273_v9 }
 0x578   :  { %1441 = vmatmul.mubr.msk.bf16.vlgmr.msra.gmra.mrb[0].mxu1 %vm153_vm1, %v274_v10 }
 0x579   :  { %639 = vmatpush1.bf16.msra.mxu1 %v1819_v21  ;;  %670 = vmatprep.mubr.bf16.mxu1 %v1729_v1 }
 0x57a   :  { %640 = vmatprep.subr.bf16.mxu1 %v1821_v22 }
 0x57d   :  { %641 = vmatpush1.bf16.msra.mxu1 %v1826_v23 }
 0x57e   :  { %642 = vmatprep.subr.bf16.mxu1 %v1830_v24 }
 0x581   :  { %643 = vmatpush1.bf16.msra.mxu1 %v1834_v25 }
 0x582   :  { %644 = vmatprep.subr.bf16.mxu1 %v1838_v26 }
 0x585   :  { %645 = vmatpush1.bf16.msra.mxu1 %v1846_v28 }
 0x586   :  { %958 = vmatprep.subr.bf16.mxu1 %v1817_v20 }
 0x64b   :  { %v352_v12 = vpop.f32.mrb[0].mxu1 }
 0x64c   :  { %v391_v14 = vadd.f32 %v390_v13, %v352_v12  ;;  %v354_v15 = vpop.f32.mrb[1].mxu1 }
 0x64d   :  { %v359_v16 = vadd.f32 %v354_v15, %v265_v11  ;;  %v356_v17 = vpop.f32.mrb[2].mxu1 }
 0x64e   :  { %v1444_v18 = vmul.f32 -1.442695, %v391_v14  ;;  %v357_v19 = vpop.f32.mrb[3].mxu1 }
 0x64f   :  { %v1442_v27 = vmul.f32 -1.442695, %v359_v16 }
 0x650   :  { %1576 = vpow2.f32 %v1444_v18 }
 0x651   :  { %1578 = vpow2.f32 %v1442_v27 }
 0x65a   :  { %v1577_v29 = vpop.eup %1576 }
 0x65b   :  { %v1579_v30 = vpop.eup %1578  ;;  %v395_v31 = vadd.f32 1.0, %v1577_v29 }
 0x65c   :  { %v363_v32 = vadd.f32 1.0, %v1579_v30 }
 0x65d   :  { %1580 = vrcp.f32 %v395_v31 }
 0x65e   :  { %1582 = vrcp.f32 %v363_v32 }
 0x667   :  { %v1581_v33 = vpop.eup %1580 }
 0x668   :  { %v1583_v34 = vpop.eup %1582  ;;  %v398_v35 = vmul.f32 2.0, %v1581_v33  ;;  %v400_v43 = vmul.f32 %v1581_v33, %v250_v61  ;;  %v550_v61 = vld [vmem:[#allocation2 + $0x3] sm:$0x1] }
 0x669   :  { %v366_v36 = vmul.f32 2.0, %v1583_v34  ;;  %v368_v45 = vmul.f32 %v1583_v34, %v217_v63 }
 0x66a   :  { %v1445_v37 = vadd.f32 -1.0, %v398_v35 }
 0x66b   :  { %v1443_v38 = vadd.f32 -1.0, %v366_v36 }
 0x66c   :  { %402 = vrot.lane.b32.xlu0 %v1445_v37, %s1730_s0 }
 0x66d   :  { %370 = vrot.lane.b32.xlu1 %v1443_v38, %s1730_s0 }
 0x6de   :  { %v403_v39 = vpop.permute.xlu0 %402 }
 0x6df   :  { %v405_v40 = vmul.f32 %v1581_v33, %v403_v39  ;;  %v371_v41 = vpop.permute.xlu1 %370 }
 0x6e0   :  { %v373_v42 = vmul.f32 %v1583_v34, %v371_v41 }
 0x6e1   :  { %407 = vrot.lane.b32.xlu0 %v405_v40, %s1731_s1 }
 0x6e2   :  { %375 = vrot.lane.b32.xlu1 %v373_v42, %s1731_s1 }
 0x753   :  { %v408_v44 = vpop.permute.xlu0 %407 }
 0x754   :  { %v410_v46 = vadd.f32 %v408_v44, %v400_v43  ;;  %v376_v47 = vpop.permute.xlu1 %375  ;;  %v585_v44 = vld [vmem:[%s2080_s4] sm:$0x1] }
 0x755   :  { %v378_v48 = vadd.f32 %v376_v47, %v368_v45 }
 0x756   :  { %1584 = vtanh.f32 %v410_v46 }
 0x757   :  { %1586 = vtanh.f32 %v378_v48 }
 0x760   :  { %v1585_v49 = vpop.eup %1584 }
 0x761   :  { %v1587_v50 = vpop.eup %1586  ;;  %413 = vrot.lane.b32.xlu0 %v1585_v49, %s1730_s0 }
 0x762   :  { %381 = vrot.lane.b32.xlu1 %v1587_v50, %s1730_s0 }
 0x7d3   :  { %v414_v51 = vpop.permute.xlu0 %413 }
 0x7d4   :  { %v416_v52 = vmul.f32 %v1581_v33, %v414_v51  ;;  %v382_v53 = vpop.permute.xlu1 %381 }
 0x7d5   :  { %v1899_v54 = vmul.f32 %v1583_v34, %v382_v53 }
 0x7d6   :  { %427 = vrot.lane.b32.xlu1 %v416_v52, %s1731_s1 }
 0x7d7   :  { %430 = vrot.lane.b32.xlu0 %v1899_v54, %s1730_s0 }
 0x848   :  { %v428_v55 = vpop.permute.xlu1 %427 }
 0x849   :  { %v431_v56 = vpop.permute.xlu0 %430 }
 0x84a   :  { %v433_v57 = vsel %vm110_vm0, %v428_v55, %v431_v56 }
 0x84b   :  { %v434_v58 = vpack.c.bf16 %v433_v57, %v433_v57 }
 0x84d   :  { %1454 = vmatmul.mubr.msk.bf16.vlgmr.msra.gmra.mrb[4].mxu0 %vm153_vm1, %v434_v58 }
 0x84e   :  { %799 = vmatpush1.bf16.msra.mxu0 %v1819_v21  ;;  %830 = vmatprep.mubr.bf16.mxu0 %v1729_v1 }
 0x84f   :  { %800 = vmatprep.subr.bf16.mxu0 %v1821_v22 }
 0x852   :  { %801 = vmatpush1.bf16.msra.mxu0 %v1826_v23 }
 0x853   :  { %802 = vmatprep.subr.bf16.mxu0 %v1830_v24 }
 0x856   :  { %803 = vmatpush1.bf16.msra.mxu0 %v1834_v25 }
 0x857   :  { %804 = vmatprep.subr.bf16.mxu0 %v1838_v26 }
 0x85a   :  { %805 = vmatpush1.bf16.msra.mxu0 %v1846_v28 }
 0x85b   :  { %1118 = vmatprep.subr.bf16.mxu0 %v1817_v20 }
 0x920   :  { %v512_v60 = vpop.f32.mrb[4].mxu0 }
 0x921   :  { %v551_v62 = vadd.f32 %v550_v61, %v512_v60  ;;  %v514_v63 = vpop.f32.mrb[5].mxu0 }
 0x922   :  { %v519_v0 = vadd.f32 %v514_v63, %v425_v59  ;;  %v516_v2 = vpop.f32.mrb[6].mxu0 }
 0x923   :  { %v1457_v3 = vmul.f32 -1.442695, %v551_v62  ;;  %v517_v4 = vpop.f32.mrb[7].mxu0 }
 0x924   :  { %v1455_v5 = vmul.f32 -1.442695, %v519_v0 }
 0x925   :  { %1588 = vpow2.f32 %v1457_v3 }
 0x926   :  { %1590 = vpow2.f32 %v1455_v5 }
 0x92f   :  { %v1589_v7 = vpop.eup %1588 }
 0x930   :  { %v1591_v8 = vpop.eup %1590  ;;  %v555_v9 = vadd.f32 1.0, %v1589_v7 }
 0x931   :  { %v523_v10 = vadd.f32 1.0, %v1591_v8 }
 0x932   :  { %1592 = vrcp.f32 %v555_v9 }
 0x933   :  { %1594 = vrcp.f32 %v523_v10 }
 0x93c   :  { %v1593_v20 = vpop.eup %1592 }
 0x93d   :  { %v1595_v11 = vpop.eup %1594  ;;  %v558_v12 = vmul.f32 2.0, %v1593_v20  ;;  %v560_v27 = vmul.f32 %v1593_v20, %v410_v46  ;;  %v710_v46 = vld [vmem:[#allocation2 + $0x4] sm:$0x1] }
 0x93e   :  { %v526_v13 = vmul.f32 2.0, %v1595_v11  ;;  %v528_v30 = vmul.f32 %v1595_v11, %v378_v48 }
 0x93f   :  { %v1458_v14 = vadd.f32 -1.0, %v558_v12 }
 0x940   :  { %v1456_v15 = vadd.f32 -1.0, %v526_v13 }
 0x941   :  { %562 = vrot.lane.b32.xlu0 %v1458_v14, %s1730_s0 }
 0x942   :  { %530 = vrot.lane.b32.xlu1 %v1456_v15, %s1730_s0 }
 0x9b3   :  { %v563_v16 = vpop.permute.xlu0 %562 }
 0x9b4   :  { %v565_v17 = vmul.f32 %v1593_v20, %v563_v16  ;;  %v531_v18 = vpop.permute.xlu1 %530 }
 0x9b5   :  { %v533_v19 = vmul.f32 %v1595_v11, %v531_v18 }
 0x9b6   :  { %567 = vrot.lane.b32.xlu0 %v565_v17, %s1731_s1 }
 0x9b7   :  { %535 = vrot.lane.b32.xlu1 %v533_v19, %s1731_s1 }
 0xa28   :  { %v568_v29 = vpop.permute.xlu0 %567 }
 0xa29   :  { %v570_v31 = vadd.f32 %v568_v29, %v560_v27  ;;  %v536_v32 = vpop.permute.xlu1 %535 }
 0xa2a   :  { %v538_v33 = vadd.f32 %v536_v32, %v528_v30  ;;  %v745_v30 = vld [vmem:[%s2080_s4] sm:$0x1] }
 0xa2b   :  { %1596 = vtanh.f32 %v570_v31 }
 0xa2c   :  { %1598 = vtanh.f32 %v538_v33 }
 0xa35   :  { %v1597_v34 = vpop.eup %1596 }
 0xa36   :  { %v1599_v35 = vpop.eup %1598  ;;  %573 = vrot.lane.b32.xlu0 %v1597_v34, %s1730_s0 }
 0xa37   :  { %541 = vrot.lane.b32.xlu1 %v1599_v35, %s1730_s0 }
 0xaa8   :  { %v574_v36 = vpop.permute.xlu0 %573 }
 0xaa9   :  { %v576_v37 = vmul.f32 %v1593_v20, %v574_v36  ;;  %v542_v38 = vpop.permute.xlu1 %541 }
 0xaaa   :  { %v1924_v39 = vmul.f32 %v1595_v11, %v542_v38 }
 0xaab   :  { %587 = vrot.lane.b32.xlu1 %v576_v37, %s1731_s1 }
 0xaac   :  { %590 = vrot.lane.b32.xlu0 %v1924_v39, %s1730_s0 }
 0xb1d   :  { %v588_v40 = vpop.permute.xlu1 %587 }
 0xb1e   :  { %v591_v41 = vpop.permute.xlu0 %590 }
 0xb1f   :  { %v593_v42 = vsel %vm110_vm0, %v588_v40, %v591_v41 }
 0xb20   :  { %v594_v43 = vpack.c.bf16 %v593_v42, %v593_v42 }
 0xb22   :  { %1467 = vmatmul.mubr.msk.bf16.vlgmr.msra.gmra.mrb[4].mxu1 %vm153_vm1, %v594_v43 }
 0xb23   :  { %959 = vmatpush1.bf16.msra.mxu1 %v1819_v21  ;;  %990 = vmatprep.mubr.bf16.mxu1 %v1729_v1 }
 0xb24   :  { %960 = vmatprep.subr.bf16.mxu1 %v1821_v22 }
 0xb27   :  { %961 = vmatpush1.bf16.msra.mxu1 %v1826_v23 }
 0xb28   :  { %962 = vmatprep.subr.bf16.mxu1 %v1830_v24 }
 0xb2b   :  { %963 = vmatpush1.bf16.msra.mxu1 %v1834_v25 }
 0xb2c   :  { %964 = vmatprep.subr.bf16.mxu1 %v1838_v26 }
 0xb2f   :  { %965 = vmatpush1.bf16.msra.mxu1 %v1846_v28 }
 0xbf5   :  { %v672_v45 = vpop.f32.mrb[4].mxu1 }
 0xbf6   :  { %v711_v47 = vadd.f32 %v710_v46, %v672_v45  ;;  %v674_v48 = vpop.f32.mrb[5].mxu1 }
 0xbf7   :  { %v679_v49 = vadd.f32 %v674_v48, %v585_v44  ;;  %v676_v50 = vpop.f32.mrb[6].mxu1 }
 0xbf8   :  { %v1470_v51 = vmul.f32 -1.442695, %v711_v47  ;;  %v677_v52 = vpop.f32.mrb[7].mxu1 }
 0xbf9   :  { %v1468_v53 = vmul.f32 -1.442695, %v679_v49 }
 0xbfa   :  { %1600 = vpow2.f32 %v1470_v51 }
 0xbfb   :  { %1602 = vpow2.f32 %v1468_v53 }
 0xc04   :  { %v1601_v55 = vpop.eup %1600 }
 0xc05   :  { %v1603_v56 = vpop.eup %1602  ;;  %v715_v57 = vadd.f32 1.0, %v1601_v55 }
 0xc06   :  { %v683_v58 = vadd.f32 1.0, %v1603_v56 }
 0xc07   :  { %1604 = vrcp.f32 %v715_v57 }
 0xc08   :  { %1606 = vrcp.f32 %v683_v58 }
 0xc11   :  { %v1605_v59 = vpop.eup %1604 }
 0xc12   :  { %v1607_v60 = vpop.eup %1606  ;;  %v718_v61 = vmul.f32 2.0, %v1605_v59  ;;  %v720_v7 = vmul.f32 %v1605_v59, %v570_v31 }
 0xc13   :  { %v686_v62 = vmul.f32 2.0, %v1607_v60  ;;  %v688_v9 = vmul.f32 %v1607_v60, %v538_v33 }
 0xc14   :  { %v1471_v63 = vadd.f32 -1.0, %v718_v61 }
 0xc15   :  { %v1469_v0 = vadd.f32 -1.0, %v686_v62 }
 0xc16   :  { %722 = vrot.lane.b32.xlu0 %v1471_v63, %s1730_s0 }
 0xc17   :  { %690 = vrot.lane.b32.xlu1 %v1469_v0, %s1730_s0 }
 0xc88   :  { %v723_v2 = vpop.permute.xlu0 %722 }
 0xc89   :  { %v725_v3 = vmul.f32 %v1605_v59, %v723_v2  ;;  %v691_v4 = vpop.permute.xlu1 %690  ;;  %v905_v2 = vld [vmem:[%s2080_s4] sm:$0x1] }
 0xc8a   :  { %v693_v5 = vmul.f32 %v1607_v60, %v691_v4  ;;  %v1030_v4 = vld [vmem:[#allocation2 + $0x6] sm:$0x1] }
 0xc8b   :  { %727 = vrot.lane.b32.xlu0 %v725_v3, %s1731_s1 }
 0xc8c   :  { %695 = vrot.lane.b32.xlu1 %v693_v5, %s1731_s1 }
 0xcfd   :  { %v728_v8 = vpop.permute.xlu0 %727 }
 0xcfe   :  { %v730_v10 = vadd.f32 %v728_v8, %v720_v7  ;;  %v696_v20 = vpop.permute.xlu1 %695 }
 0xcff   :  { %v698_v11 = vadd.f32 %v696_v20, %v688_v9 }
 0xd00   :  { %1608 = vtanh.f32 %v730_v10 }
 0xd01   :  { %1610 = vtanh.f32 %v698_v11 }
 0xd0a   :  { %v1609_v12 = vpop.eup %1608 }
 0xd0b   :  { %v1611_v13 = vpop.eup %1610  ;;  %733 = vrot.lane.b32.xlu0 %v1609_v12, %s1730_s0 }
 0xd0c   :  { %701 = vrot.lane.b32.xlu1 %v1611_v13, %s1730_s0 }
 0xd7d   :  { %v734_v14 = vpop.permute.xlu0 %733 }
 0xd7e   :  { %v736_v15 = vmul.f32 %v1605_v59, %v734_v14  ;;  %v702_v16 = vpop.permute.xlu1 %701 }
 0xd7f   :  { %v1948_v17 = vmul.f32 %v1607_v60, %v702_v16 }
 0xd80   :  { %747 = vrot.lane.b32.xlu1 %v736_v15, %s1731_s1 }
 0xd81   :  { %750 = vrot.lane.b32.xlu0 %v1948_v17, %s1730_s0 }
 0xdf2   :  { %v748_v18 = vpop.permute.xlu1 %747 }
 0xdf3   :  { %v751_v19 = vpop.permute.xlu0 %750 }
 0xdf4   :  { %v753_v27 = vsel %vm110_vm0, %v748_v18, %v751_v19 }
 0xdf5   :  { %v754_v29 = vpack.c.bf16 %v753_v27, %v753_v27 }
 0xdf7   :  { %1480 = vmatmul.mubr.msk.bf16.vlgmr.msra.gmra.mrb[8].mxu0 %vm153_vm1, %v754_v29 }
 0xdf8   :  { %1119 = vmatpush1.bf16.msra.mxu0 %v1819_v21  ;;  %1150 = vmatprep.mubr.bf16.mxu0 %v1729_v1  ;;  %v870_v21 = vld [vmem:[#allocation2 + $0x5] sm:$0x1] }
 0xdf9   :  { %1120 = vmatprep.subr.bf16.mxu0 %v1821_v22 }
 0xdfc   :  { %1121 = vmatpush1.bf16.msra.mxu0 %v1826_v23 }
 0xdfd   :  { %1122 = vmatprep.subr.bf16.mxu0 %v1830_v24 }
 0xe00   :  { %1123 = vmatpush1.bf16.msra.mxu0 %v1834_v25 }
 0xe01   :  { %1124 = vmatprep.subr.bf16.mxu0 %v1838_v26 }
 0xe04   :  { %1125 = vmatpush1.bf16.msra.mxu0 %v1846_v28 }
 0xeca   :  { %v832_v31 = vpop.f32.mrb[8].mxu0 }
 0xecb   :  { %v871_v32 = vadd.f32 %v870_v21, %v832_v31  ;;  %v834_v33 = vpop.f32.mrb[9].mxu0 }
 0xecc   :  { %v839_v34 = vadd.f32 %v834_v33, %v745_v30  ;;  %v836_v22 = vpop.f32.mrb[10].mxu0 }
 0xecd   :  { %v1483_v35 = vmul.f32 -1.442695, %v871_v32  ;;  %v837_v23 = vpop.f32.mrb[11].mxu0 }
 0xece   :  { %v1481_v36 = vmul.f32 -1.442695, %v839_v34 }
 0xecf   :  { %1612 = vpow2.f32 %v1483_v35 }
 0xed0   :  { %1614 = vpow2.f32 %v1481_v36 }
 0xed9   :  { %v1613_v24 = vpop.eup %1612 }
 0xeda   :  { %v1615_v25 = vpop.eup %1614  ;;  %v875_v26 = vadd.f32 1.0, %v1613_v24 }
 0xedb   :  { %v843_v37 = vadd.f32 1.0, %v1615_v25 }
 0xedc   :  { %1616 = vrcp.f32 %v875_v26 }
 0xedd   :  { %1618 = vrcp.f32 %v843_v37 }
 0xee6   :  { %v1617_v28 = vpop.eup %1616 }
 0xee7   :  { %v1619_v38 = vpop.eup %1618  ;;  %v878_v40 = vmul.f32 2.0, %v1617_v28  ;;  %v880_v48 = vmul.f32 %v1617_v28, %v730_v10 }
 0xee8   :  { %v846_v41 = vmul.f32 2.0, %v1619_v38  ;;  %v848_v50 = vmul.f32 %v1619_v38, %v698_v11 }
 0xee9   :  { %v1484_v42 = vadd.f32 -1.0, %v878_v40 }
 0xeea   :  { %v1482_v43 = vadd.f32 -1.0, %v846_v41 }
 0xeeb   :  { %882 = vrot.lane.b32.xlu0 %v1484_v42, %s1730_s0 }
 0xeec   :  { %850 = vrot.lane.b32.xlu1 %v1482_v43, %s1730_s0 }
 0xf5d   :  { %v883_v44 = vpop.permute.xlu0 %882 }
 0xf5e   :  { %v885_v45 = vmul.f32 %v1617_v28, %v883_v44  ;;  %v851_v46 = vpop.permute.xlu1 %850  ;;  %v1065_v44 = vld [vmem:[%s2080_s4] sm:$0x1] }
 0xf5f   :  { %v853_v47 = vmul.f32 %v1619_v38, %v851_v46  ;;  %v1190_v46 = vld [vmem:[#allocation2 + $0x7] sm:$0x1] }
 0xf60   :  { %887 = vrot.lane.b32.xlu0 %v885_v45, %s1731_s1 }
 0xf61   :  { %855 = vrot.lane.b32.xlu1 %v853_v47, %s1731_s1 }
 0xfd2   :  { %v888_v49 = vpop.permute.xlu0 %887 }
 0xfd3   :  { %v890_v51 = vadd.f32 %v888_v49, %v880_v48  ;;  %v856_v52 = vpop.permute.xlu1 %855 }
 0xfd4   :  { %v858_v53 = vadd.f32 %v856_v52, %v848_v50 }
 0xfd5   :  { %1620 = vtanh.f32 %v890_v51 }
 0xfd6   :  { %1622 = vtanh.f32 %v858_v53 }
 0xfdf   :  { %v1621_v55 = vpop.eup %1620 }
 0xfe0   :  { %v1623_v56 = vpop.eup %1622  ;;  %893 = vrot.lane.b32.xlu0 %v1621_v55, %s1730_s0 }
 0xfe1   :  { %861 = vrot.lane.b32.xlu1 %v1623_v56, %s1730_s0 }
0x1052   :  { %v894_v57 = vpop.permute.xlu0 %893 }
0x1053   :  { %v896_v58 = vmul.f32 %v1617_v28, %v894_v57  ;;  %v862_v59 = vpop.permute.xlu1 %861 }
0x1054   :  { %v1972_v60 = vmul.f32 %v1619_v38, %v862_v59 }
0x1055   :  { %907 = vrot.lane.b32.xlu1 %v896_v58, %s1731_s1 }
0x1056   :  { %910 = vrot.lane.b32.xlu0 %v1972_v60, %s1730_s0 }
0x10c7   :  { %v908_v61 = vpop.permute.xlu1 %907 }
0x10c8   :  { %v911_v62 = vpop.permute.xlu0 %910 }
0x10c9   :  { %v913_v63 = vsel %vm110_vm0, %v908_v61, %v911_v62 }
0x10ca   :  { %v914_v0 = vpack.c.bf16 %v913_v63, %v913_v63 }
0x10cc   :  { %1493 = vmatmul.mubr.msk.bf16.vlgmr.msra.gmra.mrb[8].mxu1 %vm153_vm1, %v914_v0 }
0x10cd   :  { %1310 = vmatprep.mubr.bf16.mxu1 %v1729_v1 }
0x119f   :  { %v992_v3 = vpop.f32.mrb[8].mxu1 }
0x11a0   :  { %v1031_v5 = vadd.f32 %v1030_v4, %v992_v3  ;;  %v994_v7 = vpop.f32.mrb[9].mxu1 }
0x11a1   :  { %v999_v8 = vadd.f32 %v994_v7, %v905_v2  ;;  %v996_v9 = vpop.f32.mrb[10].mxu1 }
0x11a2   :  { %v1496_v10 = vmul.f32 -1.442695, %v1031_v5  ;;  %v997_v20 = vpop.f32.mrb[11].mxu1 }
0x11a3   :  { %v1494_v11 = vmul.f32 -1.442695, %v999_v8 }
0x11a4   :  { %1624 = vpow2.f32 %v1496_v10 }
0x11a5   :  { %1626 = vpow2.f32 %v1494_v11 }
0x11ae   :  { %v1625_v12 = vpop.eup %1624 }
0x11af   :  { %v1627_v13 = vpop.eup %1626  ;;  %v1035_v14 = vadd.f32 1.0, %v1625_v12 }
0x11b0   :  { %v1003_v15 = vadd.f32 1.0, %v1627_v13  ;;  %v1546_v13 = vld [vmem:[#allocation5] ss:$8 sps:$4 sm:$0xff]  }
0x11b1   :  { %1628 = vrcp.f32 %v1035_v14  ;;  %v1548_v14 = vld [vmem:[#allocation5 + $0x4] ss:$8 sps:$4 sm:$0xff]  }
0x11b2   :  { %1630 = vrcp.f32 %v1003_v15  ;;  %v1551_v15 = vld [vmem:[#allocation5 + $0x14] ss:$8 sps:$4 sm:$0xff]   ;;  %1278 = vmatprep.subr.bf16.mxu1 %v1548_v14 }
0x11b3   :  { %1279 = vmatpush1.bf16.msra.mxu1 %v1546_v13 }
0x11b4   :  { %1280 = vmatprep.subr.bf16.mxu1 %v1551_v15 }
0x11bb   :  { %v1629_v1 = vpop.eup %1628 }
0x11bc   :  { %v1631_v16 = vpop.eup %1630  ;;  %v1038_v18 = vmul.f32 2.0, %v1629_v1  ;;  %v1040_v33 = vmul.f32 %v1629_v1, %v890_v51 }
0x11bd   :  { %v1006_v19 = vmul.f32 2.0, %v1631_v16  ;;  %v1008_v22 = vmul.f32 %v1631_v16, %v858_v53 }
0x11be   :  { %v1497_v27 = vadd.f32 -1.0, %v1038_v18  ;;  %v1552_v18 = vld [vmem:[#allocation5 + $0x20] ss:$8 sps:$4 sm:$0xff]  }
0x11bf   :  { %v1495_v29 = vadd.f32 -1.0, %v1006_v19 }
0x11c0   :  { %1042 = vrot.lane.b32.xlu0 %v1497_v27, %s1730_s0 }
0x11c1   :  { %1010 = vrot.lane.b32.xlu1 %v1495_v29, %s1730_s0  ;;  %v1555_v29 = vld [vmem:[#allocation5 + $0x30] ss:$8 sps:$4 sm:$0xff]  }
0x1232   :  { %v1043_v30 = vpop.permute.xlu0 %1042 }
0x1233   :  { %v1045_v31 = vmul.f32 %v1629_v1, %v1043_v30  ;;  %v1011_v21 = vpop.permute.xlu1 %1010  ;;  %v1557_v30 = vld [vmem:[#allocation5 + $0x34] ss:$8 sps:$4 sm:$0xff]  }
0x1234   :  { %v1013_v32 = vmul.f32 %v1631_v16, %v1011_v21 }
0x1235   :  { %1047 = vrot.lane.b32.xlu0 %v1045_v31, %s1731_s1 }
0x1236   :  { %1015 = vrot.lane.b32.xlu1 %v1013_v32, %s1731_s1 }
0x12a7   :  { %v1048_v34 = vpop.permute.xlu0 %1047 }
0x12a8   :  { %v1050_v35 = vadd.f32 %v1048_v34, %v1040_v33  ;;  %v1016_v23 = vpop.permute.xlu1 %1015 }
0x12a9   :  { %v1018_v36 = vadd.f32 %v1016_v23, %v1008_v22 }
0x12aa   :  { %1632 = vtanh.f32 %v1050_v35 }
0x12ab   :  { %1634 = vtanh.f32 %v1018_v36 }
0x12b4   :  { %v1633_v24 = vpop.eup %1632 }
0x12b5   :  { %v1635_v25 = vpop.eup %1634  ;;  %1053 = vrot.lane.b32.xlu0 %v1633_v24, %s1730_s0 }
0x12b6   :  { %1021 = vrot.lane.b32.xlu1 %v1635_v25, %s1730_s0 }
0x1327   :  { %v1054_v26 = vpop.permute.xlu0 %1053 }
0x1328   :  { %v1056_v37 = vmul.f32 %v1629_v1, %v1054_v26  ;;  %v1022_v28 = vpop.permute.xlu1 %1021  ;;  %v1549_v1 = vld [vmem:[#allocation5 + $0x10] ss:$8 sps:$4 sm:$0xff]  }
0x1329   :  { %v1989_v38 = vmul.f32 %v1631_v16, %v1022_v28  ;;  %v1554_v16 = vld [vmem:[#allocation5 + $0x24] ss:$8 sps:$4 sm:$0xff]   ;;  %1281 = vmatpush1.bf16.msra.mxu1 %v1549_v1 }
0x132a   :  { %1067 = vrot.lane.b32.xlu1 %v1056_v37, %s1731_s1  ;;  %1282 = vmatprep.subr.bf16.mxu1 %v1554_v16 }
0x132b   :  { %1070 = vrot.lane.b32.xlu0 %v1989_v38, %s1730_s0 }
0x132d   :  { %1283 = vmatpush1.bf16.msra.mxu1 %v1552_v18 }
0x132e   :  { %1284 = vmatprep.subr.bf16.mxu1 %v1557_v30 }
0x1331   :  { %1285 = vmatpush1.bf16.msra.mxu1 %v1555_v29 }
0x139c   :  { %v1068_v40 = vpop.permute.xlu1 %1067 }
0x139d   :  { %v1071_v41 = vpop.permute.xlu0 %1070 }
0x139e   :  { %v1073_v42 = vsel %vm110_vm0, %v1068_v40, %v1071_v41 }
0x139f   :  { %v1074_v43 = vpack.c.bf16 %v1073_v42, %v1073_v42 }
0x13a1   :  { %1506 = vmatmul.mubr.msk.bf16.vlgmr.msra.gmra.mrb[12].mxu0 %vm153_vm1, %v1074_v43 }
0x1474   :  { %v1152_v45 = vpop.f32.mrb[12].mxu0 }
0x1475   :  { %v1191_v47 = vadd.f32 %v1190_v46, %v1152_v45  ;;  %v1154_v48 = vpop.f32.mrb[13].mxu0 }
0x1476   :  { %v1159_v49 = vadd.f32 %v1154_v48, %v1065_v44  ;;  %v1156_v50 = vpop.f32.mrb[14].mxu0 }
0x1477   :  { %v1509_v51 = vmul.f32 -1.442695, %v1191_v47  ;;  %v1157_v52 = vpop.f32.mrb[15].mxu0 }
0x1478   :  { %v1507_v53 = vmul.f32 -1.442695, %v1159_v49 }
0x1479   :  { %1636 = vpow2.f32 %v1509_v51 }
0x147a   :  { %1638 = vpow2.f32 %v1507_v53 }
0x1483   :  { %v1637_v55 = vpop.eup %1636 }
0x1484   :  { %v1639_v56 = vpop.eup %1638  ;;  %v1195_v57 = vadd.f32 1.0, %v1637_v55 }
0x1485   :  { %v1163_v58 = vadd.f32 1.0, %v1639_v56 }
0x1486   :  { %1640 = vrcp.f32 %v1195_v57 }
0x1487   :  { %1642 = vrcp.f32 %v1163_v58  ;;  %v1522_v58 = vld [vmem:[%s2081_s5] ss:$0 sm:$0xff] }
0x1490   :  { %v1641_v59 = vpop.eup %1640 }
0x1491   :  { %v1643_v61 = vpop.eup %1642  ;;  %v1198_v62 = vmul.f32 2.0, %v1641_v59  ;;  %v1200_v8 = vmul.f32 %v1641_v59, %v1050_v35 }
0x1492   :  { %v1166_v63 = vmul.f32 2.0, %v1643_v61  ;;  %v1168_v10 = vmul.f32 %v1643_v61, %v1018_v36  ;;  %v1225_v36 = vld [vmem:[%s2080_s4] sm:$0x1]  ;;  %s1732_s4 = smov 96  }
0x1493   :  { %v1510_v0 = vadd.f32 -1.0, %v1198_v62 }
0x1494   :  { %v1508_v2 = vadd.f32 -1.0, %v1166_v63 }
0x1495   :  { %1202 = vrot.lane.b32.xlu0 %v1510_v0, %s1730_s0 }
0x1496   :  { %1170 = vrot.lane.b32.xlu1 %v1508_v2, %s1730_s0 }
0x1507   :  { %v1203_v3 = vpop.permute.xlu0 %1202 }
0x1508   :  { %v1205_v4 = vmul.f32 %v1641_v59, %v1203_v3  ;;  %v1171_v5 = vpop.permute.xlu1 %1170 }
0x1509   :  { %v1173_v7 = vmul.f32 %v1643_v61, %v1171_v5 }
0x150a   :  { %1207 = vrot.lane.b32.xlu0 %v1205_v4, %s1731_s1 }
0x150b   :  { %1175 = vrot.lane.b32.xlu1 %v1173_v7, %s1731_s1 }
0x157c   :  { %v1208_v9 = vpop.permute.xlu0 %1207 }
0x157d   :  { %v2003_v20 = vadd.f32 %v1208_v9, %v1200_v8  ;;  %v1176_v11 = vpop.permute.xlu1 %1175 }
0x157e   :  { %v1178_v12 = vadd.f32 %v1176_v11, %v1168_v10 }
0x157f   :  { %1644 = vtanh.f32 %v2003_v20 }
0x1580   :  { %1646 = vtanh.f32 %v1178_v12 }
0x1589   :  { %v1645_v19 = vpop.eup %1644 }
0x158a   :  { %v1647_v27 = vpop.eup %1646  ;;  %1213 = vrot.lane.b32.xlu0 %v1645_v19, %s1730_s0 }
0x158b   :  { %1181 = vrot.lane.b32.xlu1 %v1647_v27, %s1730_s0 }
0x15fc   :  { %v1214_v31 = vpop.permute.xlu0 %1213 }
0x15fd   :  { %v1216_v21 = vmul.f32 %v1641_v59, %v1214_v31  ;;  %v1182_v32 = vpop.permute.xlu1 %1181 }
0x15fe   :  { %v1184_v33 = vmul.f32 %v1643_v61, %v1182_v32 }
0x15ff   :  { %1227 = vrot.lane.b32.xlu1 %v1216_v21, %s1731_s1 }
0x1600   :  { %1230 = vrot.lane.b32.xlu0 %v1184_v33, %s1730_s0 }
0x1671   :  { %v1228_v34 = vpop.permute.xlu1 %1227 }
0x1672   :  { %1371 = vst.msk [vmem:[#allocation8] sm:$0x1] %vm228_vm2, %v1228_v34  ;;  %v1231_v22 = vpop.permute.xlu0 %1230 }
0x1673   :  { %v1233_v35 = vsel %vm110_vm0, %v1228_v34, %v1231_v22 }
0x1674   :  { %v1234_v23 = vpack.c.bf16 %v1233_v35, %v1233_v35 }
0x1676   :  { %1519 = vmatmul.mubr.msk.bf16.vlgmr.msra.gmra.mrb[12].mxu1 %vm153_vm1, %v1234_v23 }
0x1749   :  { %v1312_v24 = vpop.f32.mrb[12].mxu1 }
0x174a   :  { %v1313_v25 = vpop.f32.mrb[13].mxu1 }
0x174b   :  { %v1318_v26 = vadd.f32 %v1313_v25, %v1225_v36  ;;  %v1315_v37 = vpop.f32.mrb[14].mxu1 }
0x174c   :  { %v1316_v28 = vpop.f32.mrb[15].mxu1 }
0x174d   :  { %v1520_v40 = vmul.f32 -1.442695, %v1318_v26 }
0x174f   :  { %1648 = vpow2.f32 %v1520_v40 }
0x1759   :  { %v1649_v41 = vpop.eup %1648 }
0x175a   :  { %v1322_v42 = vadd.f32 1.0, %v1649_v41 }
0x175c   :  { %1650 = vrcp.f32 %v1322_v42 }
0x1766   :  { %v1651_v43 = vpop.eup %1650 }
0x1767   :  { %v1325_v44 = vmul.f32 2.0, %v1651_v43  ;;  %v1327_v48 = vmul.f32 %v1651_v43, %v1178_v12 }
0x1769   :  { %v1521_v45 = vadd.f32 -1.0, %v1325_v44 }
0x176b   :  { %1329 = vrot.lane.b32.xlu1 %v1521_v45, %s1730_s0 }
0x17dd   :  { %v1330_v46 = vpop.permute.xlu1 %1329 }
0x17de   :  { %v1332_v47 = vmul.f32 %v1651_v43, %v1330_v46 }
0x17e0   :  { %1334 = vrot.lane.b32.xlu0 %v1332_v47, %s1731_s1 }
0x17e4   :  { %225 = vrot.lane.b32.xlu0 %v1874_v6, %s1731_s1 }
0x17e8   :  { %546 = vrot.lane.b32.xlu0 %v1924_v39, %s1731_s1 }
0x17ec   :  { %866 = vrot.lane.b32.xlu0 %v1972_v60, %s1731_s1 }
0x17f0   :  { %1186 = vrot.lane.b32.xlu0 %v1184_v33, %s1731_s1 }
0x1852   :  { %v1335_v49 = vpop.permute.xlu0 %1334 }
0x1853   :  { %v1337_v50 = vadd.f32 %v1335_v49, %v1327_v48 }
0x1855   :  { %1652 = vtanh.f32 %v1337_v50 }
0x1856   :  { %v226_v51 = vpop.permute.xlu0 %225 }
0x1857   :  { %229 = vst.msk [vmem:[#allocation3] sm:$0x1] %vm228_vm2, %v226_v51 }
0x185a   :  { %v547_v52 = vpop.permute.xlu0 %546 }
0x185b   :  { %549 = vst.msk [vmem:[#allocation3 + $0x2] sm:$0x1] %vm228_vm2, %v547_v52 }
0x185e   :  { %v867_v53 = vpop.permute.xlu0 %866 }
0x185f   :  { %v1653_v6 = vpop.eup %1652  ;;  %869 = vst.msk [vmem:[#allocation3 + $0x4] sm:$0x1] %vm228_vm2, %v867_v53 }
0x1860   :  { %1340 = vrot.lane.b32.xlu1 %v1653_v6, %s1730_s0 }
0x1862   :  { %v1187_v39 = vpop.permute.xlu0 %1186 }
0x1863   :  { %1189 = vst.msk [vmem:[#allocation3 + $0x6] sm:$0x1] %vm228_vm2, %v1187_v39 }
0x1864   :  { %386 = vrot.lane.b32.xlu1 %v1899_v54, %s1731_s1 }
0x1868   :  { %706 = vrot.lane.b32.xlu1 %v1948_v17, %s1731_s1 }
0x186c   :  { %1026 = vrot.lane.b32.xlu1 %v1989_v38, %s1731_s1 }
0x18d2   :  { %v1341_v60 = vpop.permute.xlu1 %1340 }
0x18d3   :  { %v1343_v55 = vmul.f32 %v1651_v43, %v1341_v60 }
0x18d5   :  { %1345 = vrot.lane.b32.xlu1 %v1343_v55, %s1731_s1 }
0x18d6   :  { %v387_v56 = vpop.permute.xlu1 %386 }
0x18d7   :  { %389 = vst.msk [vmem:[#allocation3 + $0x1] sm:$0x1] %vm228_vm2, %v387_v56 }
0x18d9   :  { %1374 = vrot.lane.b32.xlu1 %v2003_v20, %s1732_s4 }
0x18da   :  { %v707_v57 = vpop.permute.xlu1 %706 }
0x18db   :  { %709 = vst.msk [vmem:[#allocation3 + $0x3] sm:$0x1] %vm228_vm2, %v707_v57 }
0x18dd   :  { %1379 = vrot.lane.b32.xlu1 %v1337_v50, %s1732_s4 }
0x18de   :  { %v1027_v54 = vpop.permute.xlu1 %1026 }
0x18df   :  { %1029 = vst.msk [vmem:[#allocation3 + $0x5] sm:$0x1] %vm228_vm2, %v1027_v54 }
0x1947   :  { %v1346_v17 = vpop.permute.xlu1 %1345 }
0x1948   :  { %1348 = vst.msk [vmem:[#allocation3 + $0x7] sm:$0x1] %vm228_vm2, %v1346_v17  ;;  %1372 = vst.msk [vmem:[#allocation8 + $0x1] sm:$0x1] %vm228_vm2, %v1346_v17 }
0x194b   :  { %v1375_v38 = vpop.permute.xlu1 %1374 }
0x194c   :  { %1377 = vst.msk [vmem:[#allocation9] sm:$0x1] %vm228_vm2, %v1375_v38 }
0x194f   :  { %v1380_v59 = vpop.permute.xlu1 %1379  ;;  %v1349_v61 = vld [vmem:[#allocation3] sm:$0xff] }
0x1950   :  { %1382 = vst.msk [vmem:[#allocation9 + $0x1] sm:$0x1] %vm228_vm2, %v1380_v59  ;;  %v1357_v62 = vmul.f32 %v1522_v58, %v1349_v61 }
0x1952   :  { %v1358_v63 = vsel %vm110_vm0, %v1357_v62, 0.0 }
0x1953   :  { %1359 = vadd.xlane.f32.xlu0 %v1358_v63 }
0x1954   :  { %1687 = shalt.err (!%p1684_p12)
}
0x1955   :  { %s1688_s0 = scalar_lea.hbm %s2084_s8, 32 }
0x1956   :  { %p1689_p13 = scmp.ne.s32.totalorder %s2084_s8, %s1688_s0  ;;  %p1692_p0 = scmp.lt.u32.totalorder %s1688_s0, %s2084_s8 }
0x1958   :  { %p1694_p1 = pnand %p1692_p0, %p1689_p13 }
0x195a   :  { %1697 = shalt.err (!%p1694_p1)
}
0x195b   :  { %1394 = dma.vmem_to_hbm [thread:$0]  %s1392_s25, 32, %s2084_s8, [#allocation7]  }
0x195c   :  { %s1698_s12 = scalar_lea.vmem %s1402_s27, 32  ;;  %p1703_p3 = scmp.lt.s32.totalorder %s1402_s27, %s1402_s27 }
0x195d   :  { %p1699_p2 = scmp.ne.s32.totalorder %s1402_s27, %s1698_s12  ;;  %p1704_p4 = scmp.lt.s32.totalorder %s1698_s12, %s1698_s12 }
0x195f   :  { %p1705_p5 = por %p1704_p4, %p1703_p3 }
0x1961   :  { %p1706_p6 = pnand %p1705_p5, %p1699_p2 }
0x1963   :  { %1709 = shalt.err (!%p1706_p6)
}
0x1964   :  { %s1710_s15 = scalar_lea.hbm %s2085_s9, 32 }
0x1965   :  { %p1711_p7 = scmp.ne.s32.totalorder %s2085_s9, %s1710_s15  ;;  %p1714_p8 = scmp.lt.u32.totalorder %s1710_s15, %s2085_s9 }
0x1967   :  { %p1716_p9 = pnand %p1714_p8, %p1711_p7 }
0x1969   :  { %1719 = shalt.err (!%p1716_p9)
}
0x196a   :  { %1404 = dma.vmem_to_hbm [thread:$0]  %s1402_s27, 32, %s2085_s9, [#allocation10]   ;;  %v1523_v0 = vld [vmem:[#allocation4] ss:$0 sm:$0xff]  ;;  %vm1369_vm3 = vcmask 7168  }
0x19e0   :  { %v1360_v2 = vpop.xlane.xlu0 %1359 }
0x19e1   :  { %v1368_v3 = vadd.f32 %v1523_v0, %v1360_v2 }
0x19e3   :  { %1370 = vst.msk [vmem:[%s2083_s7] sm:$0xff] %vm1369_vm3, %v1368_v3 }
0x19e4   :  { %1722 = dma.done.wait [#allocation7], 32  }
0x19e5   :  { %1723 = vsyncadd [#allocation7], 4294967264 }
0x19e6   :  { %1724 = dma.done.wait [#allocation10], 32  }
0x19e7   :  { %1725 = vsyncadd [#allocation10], 4294967264 }
0x19e8   :  { %1413 = vsyncpa [#allocation6], 1 }
0x19e9   :  { %1414 = vsyncpa [#allocation7], 1 }
0x19ea   :  { %1415 = vsyncpa [#allocation10], 1 }

</bundles_post_ra>
